<compile_context>
chip_gen: v6e
topology: v6e:2x2x1
jax: 0.10.0
libtpu: 0.0.40
codegen_flags: <defaults>
</compile_context>

<pallas_src>
import jax
import jax.numpy as jnp
from jax.experimental import pallas as pl
from jax.experimental.pallas import tpu as pltpu

_LANE = 128
_INT32_MAX = jnp.iinfo(jnp.int32).max


def _kmeans_kernel(x_ref, c_ref, half_cnorm_ref, lane_idx_ref, out_ref,
                   min_sc, idx_sc):
    # x_ref:          (TM, D)    row tile of x (resident across the K axis)
    # c_ref:          (D, TK)    centroid K-tile
    # half_cnorm_ref: (1, TK)    0.5 * ||c||^2 (f32; +inf on pad columns)
    # lane_idx_ref:   (1, TK)    global cluster ids for this K-tile (int32)
    # out_ref:        (1, 1, TM) argmin indices (int32), lane-dense
    # min_sc, idx_sc: (TM, 1)    running min / argmin accumulators (VMEM scratch)
    k_id = pl.program_id(1)

    @pl.when(k_id == 0)
    def _init():
        min_sc[...] = jnp.full_like(min_sc, jnp.inf)
        idx_sc[...] = jnp.zeros_like(idx_sc)

    # MXU: (TM, D) @ (D, TK) with f32 accumulation.
    xc = jnp.dot(x_ref[...], c_ref[...], preferred_element_type=jnp.float32)
    # Per-row ||x||^2 is constant across clusters, so it is dropped:
    # argmin(||x||^2 - 2 x.c + ||c||^2) == argmin(0.5*||c||^2 - x.c).
    score = half_cnorm_ref[...] - xc                              # (TM, TK) f32

    tile_min = jnp.min(score, axis=-1, keepdims=True)             # (TM, 1)
    # First-index-wins within the tile (lane_idx holds global cluster ids).
    masked_idx = jnp.where(score == tile_min, lane_idx_ref[...],
                           jnp.int32(_INT32_MAX))
    tile_idx = jnp.min(masked_idx, axis=-1, keepdims=True)        # (TM, 1) i32

    # Running argmin across K tiles; strict '<' keeps the earlier tile on exact
    # ties, matching torch.argmin's first-index tie break.
    better = tile_min < min_sc[...]
    idx_sc[...] = jnp.where(better, tile_idx, idx_sc[...])
    min_sc[...] = jnp.where(better, tile_min, min_sc[...])

    @pl.when(k_id == pl.num_programs(1) - 1)
    def _finalize():
        # Single lane-dense (1, 1, TM) int32 store per row tile.
        out_ref[...] = idx_sc[...].reshape(out_ref.shape)


def _round_up(a, b):
    return pl.cdiv(a, b) * b


def kmeans_forward(x, centroids, centroid_norm, *, tm=512, tk=512,
                   compute_dtype=jnp.bfloat16, interpret=False):
    """x: (N, D); centroids: (D, K); centroid_norm: (1, K). Returns (N,) int32.

    tm: row tile (multiple of 8; multiples of 128/256 best for MXU + stores).
    tk: cluster tile (rounded up to a multiple of 128).
    compute_dtype: dtype for x/centroids on the MXU (default bf16); the argmin
                   epilogue and accumulation stay float32.
    """
    n, d = x.shape
    d2, k = centroids.shape
    assert d == d2
    assert centroid_norm.shape[-1] == k

    # ---- K tiling / lane padding -------------------------------------------
    tk = max(_LANE, _round_up(min(tk, _round_up(k, _LANE)), _LANE))
    k_pad = _round_up(k, tk)
    k_tiles = k_pad // tk

    tm = max(8, _round_up(tm, 8))
    n_tiles = pl.cdiv(n, tm)   # x is NOT padded: ragged last tile via the grid

    if compute_dtype is not None:
        x = x.astype(compute_dtype)
        centroids = centroids.astype(compute_dtype)

    if k_pad != k:
        centroids = jnp.pad(centroids, ((0, 0), (0, k_pad - k)))

    # 0.5 * ||c||^2 in f32; pad columns get +inf so they can never win argmin.
    half_cnorm = (0.5 * centroid_norm.astype(jnp.float32)).reshape(1, k)
    if k_pad != k:
        half_cnorm = jnp.pad(half_cnorm, ((0, 0), (0, k_pad - k)),
                             constant_values=jnp.inf)
    # Global cluster ids, resident per K-tile (replaces per-step iota).
    lane_idx = jnp.arange(k_pad, dtype=jnp.int32).reshape(1, k_pad)

    # ---- VMEM budget (double-buffered pipelined operands + scratch) --------
    in_itemsize = jnp.dtype(x.dtype).itemsize
    vmem_est = (2 * tm * d * in_itemsize          # x tiles
                + 2 * d * tk * in_itemsize        # centroid tiles
                + 2 * 2 * tk * 4                  # half_cnorm + lane_idx rows
                + 2 * tm * 4                      # output tiles
                + 2 * tm * _LANE * 4              # (tm,1) scratch, padded layout
                + 3 * tm * tk * 4)                # score / epilogue intermediates
    vmem_limit = min(max(int(vmem_est * 1.5), 32 * 1024 * 1024),
                     64 * 1024 * 1024)

    cost = pl.CostEstimate(
        flops=2 * n * d * k_pad,
        transcendentals=0,
        bytes_accessed=(n * d * in_itemsize                 # stream x once
                        + n_tiles * d * k_pad * in_itemsize  # centroids per row tile
                        + n_tiles * tm * 4))                 # int32 output

    out = pl.pallas_call(
        _kmeans_kernel,
        out_shape=jax.ShapeDtypeStruct((n_tiles, 1, tm), jnp.int32),
        grid_spec=pltpu.PrefetchScalarGridSpec(
            num_scalar_prefetch=0,
            grid=(n_tiles, k_tiles),
            in_specs=[
                pl.BlockSpec((tm, d), lambda i, j: (i, 0)),   # x row tile
                pl.BlockSpec((d, tk), lambda i, j: (0, j)),   # centroid K-tile
                pl.BlockSpec((1, tk), lambda i, j: (0, j)),   # 0.5*||c||^2 tile
                pl.BlockSpec((1, tk), lambda i, j: (0, j)),   # cluster-id tile
            ],
            out_specs=pl.BlockSpec((1, 1, tm), lambda i, j: (i, 0, 0)),
            scratch_shapes=[pltpu.VMEM((tm, 1), jnp.float32),
                            pltpu.VMEM((tm, 1), jnp.int32)],
        ),
        compiler_params=pltpu.CompilerParams(
            dimension_semantics=("parallel", "arbitrary"),
            vmem_limit_bytes=vmem_limit),
        cost_estimate=cost,
        interpret=interpret,
    )(x, centroids, half_cnorm, lane_idx)

    return out.reshape(n_tiles * tm)[:n]


if __name__ == "__main__":
    # Small deterministic problem that exercises every structural path:
    #   * ragged last N tile (200 % 128 != 0, no jnp.pad of x),
    #   * K not lane-aligned (384 -> padded to 512, +inf pad norms),
    #   * 2 K-tiles (tk=256) driving the running min/argmin accumulator.
    N, D, K = 200, 64, 384
    key = jax.random.PRNGKey(0)
    kx, kc = jax.random.split(key)

    x = jax.random.normal(kx, (N, D), dtype=jnp.float32)
    km_model = jax.random.normal(kc, (K, D), dtype=jnp.float32)     # like np.load(...)
    centroids = km_model.T                                          # (D, K)
    centroid_norm = jnp.sum(centroids ** 2, axis=0, keepdims=True)  # (1, K)

    # --- f32 MXU path: check against the exact PyTorch forward formula ------
    units = kmeans_forward(x, centroids, centroid_norm,
                           tm=128, tk=256, compute_dtype=jnp.float32)
    units = jax.block_until_ready(units)
    assert units.shape == (N,) and units.dtype == jnp.int32

    dist_ref = (jnp.sum(x ** 2, axis=1, keepdims=True)
                - 2.0 * x @ centroids + centroid_norm)              # (N, K)
    ref = jnp.argmin(dist_ref, axis=-1).astype(jnp.int32)
    chosen_dist = jnp.take_along_axis(dist_ref, units[:, None], axis=-1)[:, 0]
    best_dist = jnp.min(dist_ref, axis=-1)
    # Every row must either match torch-argmin exactly or be an FP near-tie
    # (the kernel uses the argmin-equivalent 0.5*||c||^2 - x.c formulation).
    ok = (units == ref) | (chosen_dist <= best_dist + 1e-3)
    assert bool(jnp.all(ok)), "kernel picked a non-nearest centroid"
    assert bool(jnp.all((units >= 0) & (units < K)))

    # --- default bf16 MXU path: sanity check (near-ties may differ from f32) -
    units_bf16 = jax.block_until_ready(
        kmeans_forward(x, centroids, centroid_norm, tm=128, tk=256))
    assert units_bf16.shape == (N,)
    assert bool(jnp.all((units_bf16 >= 0) & (units_bf16 < K)))

    print("KERNEL_OK")
</pallas_src>

<mosaic_0001>
module attributes {stable_mosaic.version = 11 : i64} {
  func.func @_kmeans_kernel(%arg0: i32, %arg1: i32, %arg2: memref<128x64xf32, #tpu.memory_space<vmem>>, %arg3: memref<64x256xf32, #tpu.memory_space<vmem>>, %arg4: memref<1x256xf32, #tpu.memory_space<vmem>>, %arg5: memref<1x256xi32, #tpu.memory_space<vmem>>, %arg6: memref<1x1x128xi32, #tpu.memory_space<vmem>>, %arg7: memref<128x1xf32, #tpu.memory_space<vmem>>, %arg8: memref<128x1xi32, #tpu.memory_space<vmem>>) attributes {dimension_semantics = [#tpu.dimension_semantics<parallel>, #tpu.dimension_semantics<arbitrary>], iteration_bounds = array<i64: 2, 2>, scalar_prefetch = 0 : i64, scratch_operands = 2 : i64, tpu.core_type = #tpu.core_type<tc>, window_params = [{transform_indices = @transform_0, window_bounds = array<i64: 128, 64>}, {transform_indices = @transform_1, window_bounds = array<i64: 64, 256>}, {transform_indices = @transform_2, window_bounds = array<i64: 1, 256>}, {transform_indices = @transform_3, window_bounds = array<i64: 1, 256>}, {transform_indices = @transform_4, window_bounds = array<i64: 1, 1, 128>}]} {
    %c0_i32 = arith.constant 0 : i32
    %0 = arith.cmpi eq, %arg1, %c0_i32 : i32
    %1 = arith.extui %0 : i1 to i32
    %c0_i32_0 = arith.constant 0 : i32
    %2 = arith.cmpi ne, %1, %c0_i32_0 : i32
    scf.if %2 {
      %cst_21 = arith.constant 0x7F800000 : f32
      %31 = vector.broadcast %cst_21 : f32 to vector<128x1xf32>
      %c0_22 = arith.constant 0 : index
      %c0_23 = arith.constant 0 : index
      %32 = vector.load %arg7[%c0_22, %c0_23] : memref<128x1xf32, #tpu.memory_space<vmem>>, vector<128x1xf32>
      tpu.vector_store %arg7[%c0_22, %c0_23], %31 {strides = array<i32>} : memref<128x1xf32, #tpu.memory_space<vmem>>, vector<128x1xf32>,
      %c0_i32_24 = arith.constant 0 : i32
      %33 = vector.broadcast %c0_i32_24 : i32 to vector<128x1xi32>
      %c0_25 = arith.constant 0 : index
      %c0_26 = arith.constant 0 : index
      %34 = vector.load %arg8[%c0_25, %c0_26] : memref<128x1xi32, #tpu.memory_space<vmem>>, vector<128x1xi32>
      tpu.vector_store %arg8[%c0_25, %c0_26], %33 {strides = array<i32>} : memref<128x1xi32, #tpu.memory_space<vmem>>, vector<128x1xi32>,
    } else {
    }
    %c0 = arith.constant 0 : index
    %c0_1 = arith.constant 0 : index
    %3 = vector.load %arg2[%c0, %c0_1] : memref<128x64xf32, #tpu.memory_space<vmem>>, vector<128x64xf32>
    %c0_2 = arith.constant 0 : index
    %c0_3 = arith.constant 0 : index
    %4 = vector.load %arg3[%c0_2, %c0_3] : memref<64x256xf32, #tpu.memory_space<vmem>>, vector<64x256xf32>
    %cst = arith.constant dense<0.000000e+00> : vector<128x256xf32>
    %5 = tpu.matmul %3, %4, %cst {dimension_numbers = #tpu.dot_dimension_numbers<[1], [0], [0], [1], [0, 0, 1, 1], [], []>} : vector<128x64xf32>, vector<64x256xf32>, vector<128x256xf32> -> vector<128x256xf32>
    %c0_4 = arith.constant 0 : index
    %c0_5 = arith.constant 0 : index
    %6 = vector.load %arg4[%c0_4, %c0_5] : memref<1x256xf32, #tpu.memory_space<vmem>>, vector<1x256xf32>
    %7 = vector.broadcast %6 : vector<1x256xf32> to vector<128x256xf32>
    %8 = arith.subf %7, %5 : vector<128x256xf32>
    %cst_6 = arith.constant dense<0x7F800000> : vector<128xf32>
    %9 = vector.multi_reduction <minimumf>, %8, %cst_6 [1] : vector<128x256xf32> to vector<128xf32>
    %10 = vector.shape_cast %9 : vector<128xf32> to vector<128x1xf32>
    %11 = vector.broadcast %10 : vector<128x1xf32> to vector<128x256xf32>
    %12 = arith.cmpf oeq, %8, %11 : vector<128x256xf32>
    %c0_7 = arith.constant 0 : index
    %c0_8 = arith.constant 0 : index
    %13 = vector.load %arg5[%c0_7, %c0_8] : memref<1x256xi32, #tpu.memory_space<vmem>>, vector<1x256xi32>
    %c2147483647_i32 = arith.constant 2147483647 : i32
    %14 = vector.shape_cast %13 : vector<1x256xi32> to vector<1x256xi32>
    %15 = vector.broadcast %14 : vector<1x256xi32> to vector<128x256xi32>
    %16 = vector.broadcast %c2147483647_i32 : i32 to vector<128x256xi32>
    %17 = arith.select %12, %15, %16 : vector<128x256xi1>, vector<128x256xi32>
    %cst_9 = arith.constant dense<2147483647> : vector<128xi32>
    %18 = vector.multi_reduction <minsi>, %17, %cst_9 [1] : vector<128x256xi32> to vector<128xi32>
    %19 = vector.shape_cast %18 : vector<128xi32> to vector<128x1xi32>
    %c0_10 = arith.constant 0 : index
    %c0_11 = arith.constant 0 : index
    %20 = vector.load %arg7[%c0_10, %c0_11] : memref<128x1xf32, #tpu.memory_space<vmem>>, vector<128x1xf32>
    %21 = arith.cmpf olt, %10, %20 : vector<128x1xf32>
    %c0_12 = arith.constant 0 : index
    %c0_13 = arith.constant 0 : index
    %22 = vector.load %arg8[%c0_12, %c0_13] : memref<128x1xi32, #tpu.memory_space<vmem>>, vector<128x1xi32>
    %23 = arith.select %21, %19, %22 : vector<128x1xi1>, vector<128x1xi32>
    %c0_14 = arith.constant 0 : index
    %c0_15 = arith.constant 0 : index
    %24 = vector.load %arg8[%c0_14, %c0_15] : memref<128x1xi32, #tpu.memory_space<vmem>>, vector<128x1xi32>
    tpu.vector_store %arg8[%c0_14, %c0_15], %23 {strides = array<i32>} : memref<128x1xi32, #tpu.memory_space<vmem>>, vector<128x1xi32>,
    %c0_16 = arith.constant 0 : index
    %c0_17 = arith.constant 0 : index
    %25 = vector.load %arg7[%c0_16, %c0_17] : memref<128x1xf32, #tpu.memory_space<vmem>>, vector<128x1xf32>
    %26 = arith.select %21, %10, %25 : vector<128x1xi1>, vector<128x1xf32>
    %c0_18 = arith.constant 0 : index
    %c0_19 = arith.constant 0 : index
    %27 = vector.load %arg7[%c0_18, %c0_19] : memref<128x1xf32, #tpu.memory_space<vmem>>, vector<128x1xf32>
    tpu.vector_store %arg7[%c0_18, %c0_19], %26 {strides = array<i32>} : memref<128x1xf32, #tpu.memory_space<vmem>>, vector<128x1xf32>,
    %c1_i32 = arith.constant 1 : i32
    %28 = arith.cmpi eq, %arg1, %c1_i32 : i32
    %29 = arith.extui %28 : i1 to i32
    %c0_i32_20 = arith.constant 0 : i32
    %30 = arith.cmpi ne, %29, %c0_i32_20 : i32
    scf.if %30 {
      %c0_21 = arith.constant 0 : index
      %c0_22 = arith.constant 0 : index
      %31 = vector.load %arg8[%c0_21, %c0_22] : memref<128x1xi32, #tpu.memory_space<vmem>>, vector<128x1xi32>
      %32 = vector.shape_cast %31 : vector<128x1xi32> to vector<1x1x128xi32>
      %c0_23 = arith.constant 0 : index
      %c0_24 = arith.constant 0 : index
      %c0_25 = arith.constant 0 : index
      %33 = vector.load %arg6[%c0_23, %c0_24, %c0_25] : memref<1x1x128xi32, #tpu.memory_space<vmem>>, vector<1x1x128xi32>
      tpu.vector_store %arg6[%c0_23, %c0_24, %c0_25], %32 {strides = array<i32>} : memref<1x1x128xi32, #tpu.memory_space<vmem>>, vector<1x1x128xi32>,
    } else {
    }
    return
  }
  func.func @transform_0(%arg0: i32, %arg1: i32) -> (i32, i32) {
    %c0_i32 = arith.constant 0 : i32
    %c0_i32_0 = arith.constant 0 : i32
    return %arg0, %c0_i32 : i32, i32
  }
  func.func @transform_1(%arg0: i32, %arg1: i32) -> (i32, i32) {
    %c0_i32 = arith.constant 0 : i32
    %c0_i32_0 = arith.constant 0 : i32
    return %c0_i32, %arg1 : i32, i32
  }
  func.func @transform_2(%arg0: i32, %arg1: i32) -> (i32, i32) {
    %c0_i32 = arith.constant 0 : i32
    %c0_i32_0 = arith.constant 0 : i32
    return %c0_i32, %arg1 : i32, i32
  }
  func.func @transform_3(%arg0: i32, %arg1: i32) -> (i32, i32) {
    %c0_i32 = arith.constant 0 : i32
    %c0_i32_0 = arith.constant 0 : i32
    return %c0_i32, %arg1 : i32, i32
  }
  func.func @transform_4(%arg0: i32, %arg1: i32) -> (i32, i32, i32) {
    %c0_i32 = arith.constant 0 : i32
    %c0_i32_0 = arith.constant 0 : i32
    %c0_i32_1 = arith.constant 0 : i32
    return %arg0, %c0_i32, %c0_i32_0 : i32, i32, i32
  }
}

</mosaic_0001>

<bundles_post_ra>
// kernel: tpu_custom_call.1
= control target key start
LH: loop header
LB: loop body
LE: loop exit
PB: predicated region body
PF: predicated region fallthrough
CT: control target
= control target key end

     0   :  { %s2843_s0 = inlined_call_operand.vmem [shape: f32[200,64], index: 0, kind: input, shape index: {}]   ;;  %s2844_s1 = inlined_call_operand.vmem [shape: f32[64,512], index: 1, kind: input, shape index: {}]   ;;  %s2845_s2 = inlined_call_operand.vmem [shape: f32[1,512], index: 2, kind: input, shape index: {}]   ;;  %s2846_s3 = inlined_call_operand.vmem [shape: s32[1,512], index: 3, kind: input, shape index: {}]   ;;  %s2847_s4 = inlined_call_operand.hbm [shape: s32[2,1,128], index: 4, kind: output, shape index: {}]  }
   0x1   :  { %2878 = sst [smem:[#allocation23_spill]] %s2844_s1 }
   0x2   :  { %9 = vsyncpa [#allocation6], 0 }
   0x3   :  { %11 = vsyncpa [#allocation6 + $0x1], 0  ;;  %s1746_s15 = smov 0   ;;  %s1748_s16 = smov 0  }
   0x4   :  { %s1750_s17 = smov 0   ;;  %s1752_s18 = smov 0  }
   0x5   :  { %s1754_s19 = smov 0   ;;  %s1756_s20 = smov 0  }
   0x6   :  { %s1758_s21 = smov 0   ;;  %s1760_s22 = smov 0  }
   0x7   :  { %s1762_s23 = smov 0   ;;  %s1764_s24 = smov 0  }
   0x8 LB: > { %2879 = sst [smem:[#allocation8_spill]] %s1706_s22  ;;  %s1462_s25 = sadd.s32 4294967295, %s1714_s24   ;;  %s1714_s24 = sphi %s1764_s24, %s17_s24   ;;  %s1710_s23 = sphi %s1762_s23, %s2928_s23   ;;  %s1706_s22 = sphi %s1760_s22, %s2927_s22   ;;  %s1702_s21 = sphi %s1758_s21, %s2926_s21   ;;  %s1698_s20 = sphi %s1756_s20, %s2925_s20   ;;  %s1694_s19 = sphi %s1754_s19, %s2933_s19   ;;  %s1690_s18 = sphi %s1752_s18, %s2932_s18   ;;  %s1686_s17 = sphi %s1750_s17, %s2931_s17   ;;  %s1682_s16 = sphi %s1748_s16, %s2930_s16   ;;  %s1678_s15 = sphi %s1746_s15, %s2929_s15  }
   0x9   : > { %2880 = sst [smem:[#allocation9_spill]] %s1710_s23  ;;  %s1463_s26 = sadd.s32 4294967294, %s1714_s24  }
   0xa   : > { %s26_s27 = sadd.s32 1, %s1706_s22  ;;  %s29_s28 = sadd.s32 1, %s1710_s23 }
   0xb   : > { %p27_p0 = scmp.ge.s32.totalorder %s26_s27, 2  ;;  %s62_s29 = sadd.s32 1, %s1694_s19 }
   0xc   : > { %p69_p1 = scmp.ne.s32.totalorder %s1694_s19, %s1690_s18  ;;  %p70_p2 = scmp.eq.s32.totalorder %s1714_s24, 0 }
   0xd   : > { %s2935_s27 = smov (%p27_p0, %s26_s27), 0  ;;  %s2937_s28 = smov (!%p27_p0, %s29_s28), %s1710_s23 }
   0xe   : > { %2881 = sst [smem:[#allocation10_spill]] %s2935_s27  ;;  %s59_s30 = ssub.s32 %s1706_s22, %s2935_s27 }
   0xf   : > { %p1809_p3 = por %p70_p2, %p69_p1  ;;  %p31_p4 = scmp.ge.s32.totalorder %s2937_s28, 2 }
  0x10   : > { %p60_p5 = scmp.eq.s32.totalorder %s59_s30, 0  ;;  %s140_s6 = sadd.s32 1, %s1686_s17 }
  0x11   : > { %p150_p6 = scmp.ne.s32.totalorder %s1686_s17, %s1682_s16  ;;  %s2939_s28 = smov (%p31_p4, %s2937_s28), 0 }
  0x12   : > { %2883 = sst [smem:[#allocation11_spill]] %s2939_s28  ;;  %s137_s8 = ssub.s32 %s1710_s23, %s2939_s28 }
  0x13   : > { %s1819_s7 = scalar_select %p60_p5, %s1694_s19, %s62_s29  }
  0x14   : > { %p151_p7 = scmp.eq.s32.totalorder %s1462_s25, 3  ;;  %p138_p8 = scmp.eq.s32.totalorder %s137_s8, 0 }
  0x15   : > { %p156_p9 = scmp.ne.s32.totalorder %s1682_s16, %s1678_s15  ;;  %p157_p11 = scmp.eq.s32.totalorder %s1463_s26, 3 }
  0x16   : > { %p1825_p10 = por %p151_p7, %p150_p6  ;;  %p1465_p13 = scmp.ge.s32.totalorder %s1714_s24, 4 }
  0x17   : > { %s1830_s10 = scalar_select %p138_p8, %s1686_s17, %s140_s6  }
  0x18   : > { %p1832_p12 = por %p157_p11, %p156_p9  ;;  %173 = sbr.rel (%p1465_p13) target bundleno = 47 (0x2f), region = 16 }
  0x1d   : > { %193 = sbr.rel (!%p1809_p3) target bundleno = 47 (0x2f), region = 24  ;;  %s195_s12 = sand.u32 (%p1809_p3), 1, %s1694_s19  }
  0x1e   : > { %s1496_s13 = sshll.u32 (%p1809_p3), %s1706_s22, 4  ;;  %s1466_s14 = sshll.u32 (%p1809_p3), %s195_s12, 7 }
  0x1f   : > { %s2886_s1 = sld [smem:[#allocation23_spill]] (%p1809_p3)  ;;  %s197_s30 = scalar_lea.vmem (%p1809_p3), [#allocation4], %s1466_s14 }
  0x25   : > { %s1844_s26 = scalar_lea.vmem %s2886_s1, %s1496_s13 }
  0x26   : > { %v213_v0 = vld [vmem:[%s1844_s26] sm:$0xff]  ;;  %v215_v1 = vld [vmem:[%s1844_s26 + $0x8] sm:$0xff] }
  0x27   : > { %v217_v2 = vld [vmem:[%s1844_s26 + $0x20] sm:$0xff]  ;;  %214 = vst [vmem:[%s197_s30] sm:$0xff] %v213_v0  ;;  %216 = vst [vmem:[%s197_s30 + $0x8] sm:$0xff] %v215_v1  ;;  %v219_v3 = vld [vmem:[%s1844_s26 + $0x28] sm:$0xff] }
  0x28   : > { %218 = vst [vmem:[%s197_s30 + $0x10] sm:$0xff] %v217_v2  ;;  %v221_v4 = vld [vmem:[%s1844_s26 + $0x40] sm:$0xff]  ;;  %v223_v5 = vld [vmem:[%s1844_s26 + $0x48] sm:$0xff]  ;;  %220 = vst [vmem:[%s197_s30 + $0x18] sm:$0xff] %v219_v3 }
  0x29   : > { %222 = vst [vmem:[%s197_s30 + $0x20] sm:$0xff] %v221_v4  ;;  %224 = vst [vmem:[%s197_s30 + $0x28] sm:$0xff] %v223_v5  ;;  %v225_v6 = vld [vmem:[%s1844_s26 + $0x60] sm:$0xff]  ;;  %v227_v7 = vld [vmem:[%s1844_s26 + $0x68] sm:$0xff] }
  0x2a   : > { %v229_v8 = vld [vmem:[%s1844_s26 + $0x80] sm:$0xff]  ;;  %226 = vst [vmem:[%s197_s30 + $0x30] sm:$0xff] %v225_v6  ;;  %228 = vst [vmem:[%s197_s30 + $0x38] sm:$0xff] %v227_v7  ;;  %v231_v9 = vld [vmem:[%s1844_s26 + $0x88] sm:$0xff] }
  0x2b   : > { %230 = vst [vmem:[%s197_s30 + $0x40] sm:$0xff] %v229_v8  ;;  %v233_v10 = vld [vmem:[%s1844_s26 + $0xa0] sm:$0xff]  ;;  %v235_v11 = vld [vmem:[%s1844_s26 + $0xa8] sm:$0xff]  ;;  %232 = vst [vmem:[%s197_s30 + $0x48] sm:$0xff] %v231_v9 }
  0x2c   : > { %234 = vst [vmem:[%s197_s30 + $0x50] sm:$0xff] %v233_v10  ;;  %236 = vst [vmem:[%s197_s30 + $0x58] sm:$0xff] %v235_v11  ;;  %v237_v12 = vld [vmem:[%s1844_s26 + $0xc0] sm:$0xff]  ;;  %v239_v13 = vld [vmem:[%s1844_s26 + $0xc8] sm:$0xff] }
  0x2d   : > { %v241_v14 = vld [vmem:[%s1844_s26 + $0xe0] sm:$0xff]  ;;  %238 = vst [vmem:[%s197_s30 + $0x60] sm:$0xff] %v237_v12  ;;  %240 = vst [vmem:[%s197_s30 + $0x68] sm:$0xff] %v239_v13  ;;  %v243_v15 = vld [vmem:[%s1844_s26 + $0xe8] sm:$0xff] }
  0x2e   : > { %242 = vst [vmem:[%s197_s30 + $0x70] sm:$0xff] %v241_v14  ;;  %244 = vst [vmem:[%s197_s30 + $0x78] sm:$0xff] %v243_v15 }
  0x2f PF: > { %p1469_p0 = scmp.ge.s32.totalorder %s1714_s24, 1  ;;  %p265_p1 = scmp.lt.s32.totalorder %s1714_s24, 5 }
  0x31   : > { %p266_p2 = pnand %p1469_p0, %p265_p1 }
  0x33   : > { %269 = sbr.rel (%p266_p2) target bundleno = 963 (0x3c3), region = 55 }
  0x38   : > { %s272_s5 = sand.u32 1, %s1690_s18   ;;  %s1867_s12 = sshll.u32 %s1702_s21, 4 }
  0x39   : > { %s1470_s8 = sshll.u32 %s272_s5, 7  ;;  %p318_p3 = scmp.lt.s32.totalorder %s1867_s12, 24 }
  0x3a   : > { %s1473_s13 = sshll.u32 %s1698_s20, 1  ;;  %s1887_s27 = scalar_lea.vmem [#allocation4], %s1470_s8 }
  0x3b   : > { %p329_p4 = scmp.lt.s32.totalorder %s1473_s13, 3  ;;  %s2887_s23 = sand.u32 1, %s1682_s16  }
  0x3c   : > { %s319_s14 = scalar_select %p318_p3, %s1867_s12, 24 }
  0x3d   : > { %s2941_s13 = smov (!%p329_p4, %s1473_s13), 3  ;;  %s1891_s22 = scalar_lea.vmem [#allocation5], %s2887_s23 }
  0x3e   : > { %s1472_s25 = sshll.u32 %s319_s14, 3  ;;  %s331_s21 = scalar_lea.vmem %s2845_s2, %s2941_s13 }
  0x3f   : > { %s1877_s30 = scalar_lea.vmem %s2843_s0, %s1472_s25  ;;  %s336_s28 = scalar_lea.vmem %s2846_s3, %s2941_s13 }
  0x40   : > { %p1475_p5 = scmp.ne.s32.totalorder %s1698_s20, 0 }
  0x42   : > { %341 = sbr.rel (%p1475_p5) target bundleno = 88 (0x58), region = 63 }
  0x47   : > { %vm342_vm0 = vcmask 7168   ;;  %v1716_v16 = vmov inf   ;;  %v1717_v17 = vmov 0  }
  0x48   : > { %343 = vst.msk [vmem:[#allocation2] sm:$0xff] %vm342_vm0, %v1716_v16  ;;  %344 = vst.msk [vmem:[#allocation2 + $0x8] sm:$0xff] %vm342_vm0, %v1716_v16 }
  0x49   : > { %345 = vst.msk [vmem:[#allocation2 + $0x10] sm:$0xff] %vm342_vm0, %v1716_v16  ;;  %346 = vst.msk [vmem:[#allocation2 + $0x18] sm:$0xff] %vm342_vm0, %v1716_v16 }
  0x4a   : > { %347 = vst.msk [vmem:[#allocation2 + $0x20] sm:$0xff] %vm342_vm0, %v1716_v16  ;;  %348 = vst.msk [vmem:[#allocation2 + $0x28] sm:$0xff] %vm342_vm0, %v1716_v16 }
  0x4b   : > { %349 = vst.msk [vmem:[#allocation2 + $0x30] sm:$0xff] %vm342_vm0, %v1716_v16  ;;  %350 = vst.msk [vmem:[#allocation2 + $0x38] sm:$0xff] %vm342_vm0, %v1716_v16 }
  0x4c   : > { %351 = vst.msk [vmem:[#allocation2 + $0x40] sm:$0xff] %vm342_vm0, %v1716_v16  ;;  %352 = vst.msk [vmem:[#allocation2 + $0x48] sm:$0xff] %vm342_vm0, %v1716_v16 }
  0x4d   : > { %353 = vst.msk [vmem:[#allocation2 + $0x50] sm:$0xff] %vm342_vm0, %v1716_v16  ;;  %354 = vst.msk [vmem:[#allocation2 + $0x58] sm:$0xff] %vm342_vm0, %v1716_v16 }
  0x4e   : > { %355 = vst.msk [vmem:[#allocation2 + $0x60] sm:$0xff] %vm342_vm0, %v1716_v16  ;;  %356 = vst.msk [vmem:[#allocation2 + $0x68] sm:$0xff] %vm342_vm0, %v1716_v16 }
  0x4f   : > { %357 = vst.msk [vmem:[#allocation2 + $0x70] sm:$0xff] %vm342_vm0, %v1716_v16  ;;  %358 = vst.msk [vmem:[#allocation2 + $0x78] sm:$0xff] %vm342_vm0, %v1716_v16 }
  0x50   : > { %359 = vst.msk [vmem:[#allocation3] sm:$0xff] %vm342_vm0, %v1717_v17  ;;  %360 = vst.msk [vmem:[#allocation3 + $0x8] sm:$0xff] %vm342_vm0, %v1717_v17 }
  0x51   : > { %361 = vst.msk [vmem:[#allocation3 + $0x10] sm:$0xff] %vm342_vm0, %v1717_v17  ;;  %362 = vst.msk [vmem:[#allocation3 + $0x18] sm:$0xff] %vm342_vm0, %v1717_v17 }
  0x52   : > { %363 = vst.msk [vmem:[#allocation3 + $0x20] sm:$0xff] %vm342_vm0, %v1717_v17  ;;  %364 = vst.msk [vmem:[#allocation3 + $0x28] sm:$0xff] %vm342_vm0, %v1717_v17 }
  0x53   : > { %365 = vst.msk [vmem:[#allocation3 + $0x30] sm:$0xff] %vm342_vm0, %v1717_v17  ;;  %366 = vst.msk [vmem:[#allocation3 + $0x38] sm:$0xff] %vm342_vm0, %v1717_v17 }
  0x54   : > { %367 = vst.msk [vmem:[#allocation3 + $0x40] sm:$0xff] %vm342_vm0, %v1717_v17  ;;  %368 = vst.msk [vmem:[#allocation3 + $0x48] sm:$0xff] %vm342_vm0, %v1717_v17 }
  0x55   : > { %369 = vst.msk [vmem:[#allocation3 + $0x50] sm:$0xff] %vm342_vm0, %v1717_v17  ;;  %370 = vst.msk [vmem:[#allocation3 + $0x58] sm:$0xff] %vm342_vm0, %v1717_v17 }
  0x56   : > { %371 = vst.msk [vmem:[#allocation3 + $0x60] sm:$0xff] %vm342_vm0, %v1717_v17  ;;  %372 = vst.msk [vmem:[#allocation3 + $0x68] sm:$0xff] %vm342_vm0, %v1717_v17 }
  0x57   : > { %373 = vst.msk [vmem:[#allocation3 + $0x70] sm:$0xff] %vm342_vm0, %v1717_v17  ;;  %374 = vst.msk [vmem:[#allocation3 + $0x78] sm:$0xff] %vm342_vm0, %v1717_v17 }
  0x58 PF: > { %v406_v18 = vld [vmem:[%s1887_s27 + $0x78] sm:$0xff]  ;;  %v405_v19 = vld [vmem:[%s1887_s27 + $0x70] sm:$0xff]  ;;  %v404_v20 = vld [vmem:[%s1887_s27 + $0x68] sm:$0xff]  ;;  %vm407_vm1 = vcmask 523264   ;;  %v1718_v36 = vmov 0.0   ;;  %v2856_v51 = vlaneseq  ;;  %vm1102_vm2 = vcmask 7168  }
  0x59   : > { %472 = vmatprep.subr.mxu0 %v406_v18  ;;  %1497 = vmatprep.subr.mxu1 %v406_v18  ;;  %v403_v21 = vld [vmem:[%s1887_s27 + $0x60] sm:$0xff]  ;;  %v402_v22 = vld [vmem:[%s1887_s27 + $0x58] sm:$0xff]  ;;  %v401_v23 = vld [vmem:[%s1887_s27 + $0x50] sm:$0xff]  ;;  %p1492_p6 = scmp.ne.s32.totalorder %s1698_s20, 1 }
  0x5a   : > { %473 = vmatpush1.msra.mxu0 %v405_v19  ;;  %1505 = vmatpush1.msra.mxu1 %v405_v19  ;;  %v400_v24 = vld [vmem:[%s1887_s27 + $0x48] sm:$0xff]  ;;  %v399_v25 = vld [vmem:[%s1887_s27 + $0x40] sm:$0xff]  ;;  %v398_v26 = vld [vmem:[%s1887_s27 + $0x38] sm:$0xff]  ;;  %v1975_v52 = vshrl.u32 %v2856_v51, 7 }
  0x5b   : > { %474 = vmatprep.subr.mxu0 %v404_v20  ;;  %1498 = vmatprep.subr.mxu1 %v404_v20  ;;  %v397_v27 = vld [vmem:[%s1887_s27 + $0x30] sm:$0xff]  ;;  %v396_v28 = vld [vmem:[%s1887_s27 + $0x28] sm:$0xff]  ;;  %v395_v29 = vld [vmem:[%s1887_s27 + $0x20] sm:$0xff] }
  0x5c   : > { %475 = vmatpush1.msra.mxu0 %v403_v21  ;;  %1506 = vmatpush1.msra.mxu1 %v403_v21  ;;  %v394_v30 = vld [vmem:[%s1887_s27 + $0x18] sm:$0xff]  ;;  %v393_v31 = vld [vmem:[%s1887_s27 + $0x10] sm:$0xff]  ;;  %v392_v32 = vld [vmem:[%s1887_s27 + $0x8] sm:$0xff]  ;;  %2888 = vst [vmem:[#allocation12_spill] sm:$0xff] %v1975_v52  ;;  %v621_v53 = vsub.s32 0, %v1975_v52  ;;  %v625_v54 = vsub.s32 1, %v1975_v52 }
  0x5d   : > { %476 = vmatprep.subr.mxu0 %v402_v22  ;;  %1499 = vmatprep.subr.mxu1 %v402_v22  ;;  %v391_v33 = vld [vmem:[%s1887_s27] sm:$0xff]  ;;  %v376_v37 = vld [vmem:[%s1877_s30 + $0x8] sm:$0xff]  ;;  %v377_v39 = vld [vmem:[%s1877_s30 + $0x10] sm:$0xff] }
  0x5e   : > { %477 = vmatpush1.msra.mxu0 %v401_v23  ;;  %1507 = vmatpush1.msra.mxu1 %v401_v23  ;;  %v375_v34 = vld [vmem:[%s1877_s30] sm:$0xff]  ;;  %v384_v38 = vld [vmem:[%s1877_s30 + $0x48] sm:$0xff]  ;;  %v385_v40 = vld [vmem:[%s1877_s30 + $0x50] sm:$0xff] }
  0x5f   : > { %478 = vmatprep.subr.mxu0 %v400_v24  ;;  %1500 = vmatprep.subr.mxu1 %v400_v24  ;;  %v383_v35 = vld [vmem:[%s1877_s30 + $0x40] sm:$0xff]  ;;  %v378_v41 = vld [vmem:[%s1877_s30 + $0x18] sm:$0xff]  ;;  %v380_v45 = vld [vmem:[%s1877_s30 + $0x28] sm:$0xff] }
  0x60   : > { %479 = vmatpush1.msra.mxu0 %v399_v25  ;;  %1508 = vmatpush1.msra.mxu1 %v399_v25  ;;  %v386_v42 = vld [vmem:[%s1877_s30 + $0x58] sm:$0xff]  ;;  %v379_v43 = vld [vmem:[%s1877_s30 + $0x20] sm:$0xff]  ;;  %v388_v46 = vld [vmem:[%s1877_s30 + $0x68] sm:$0xff] }
  0x61   : > { %480 = vmatprep.subr.mxu0 %v398_v26  ;;  %1501 = vmatprep.subr.mxu1 %v398_v26  ;;  %v387_v44 = vld [vmem:[%s1877_s30 + $0x60] sm:$0xff]  ;;  %v381_v47 = vld [vmem:[%s1877_s30 + $0x30] sm:$0xff]  ;;  %v382_v49 = vld [vmem:[%s1877_s30 + $0x38] sm:$0xff] }
  0x62   : > { %481 = vmatpush1.msra.mxu0 %v397_v27  ;;  %1509 = vmatpush1.msra.mxu1 %v397_v27  ;;  %v389_v48 = vld [vmem:[%s1877_s30 + $0x70] sm:$0xff]  ;;  %v390_v50 = vld [vmem:[%s1877_s30 + $0x78] sm:$0xff]  ;;  %v617_v55 = vld [vmem:[%s331_s21] sm:$0x3] }
  0x63   : > { %482 = vmatprep.subr.mxu0 %v396_v28  ;;  %1502 = vmatprep.subr.mxu1 %v396_v28  ;;  %v1986_v56 = vrot.slane %v617_v55, %v621_v53  ;;  %v1990_v57 = vrot.slane %v617_v55, %v625_v54 }
  0x64   : > { %483 = vmatpush1.msra.mxu0 %v395_v29  ;;  %1510 = vmatpush1.msra.mxu1 %v395_v29 }
  0x65   : > { %484 = vmatprep.subr.mxu0 %v394_v30  ;;  %1503 = vmatprep.subr.mxu1 %v394_v30 }
  0x66   : > { %485 = vmatpush1.msra.mxu0 %v393_v31  ;;  %1511 = vmatpush1.msra.mxu1 %v393_v31 }
  0x67   : > { %486 = vmatprep.subr.mxu0 %v392_v32  ;;  %1504 = vmatprep.subr.mxu1 %v392_v32 }
  0x68   : > { %487 = vmatpush1.msra.mxu0 %v391_v33  ;;  %1512 = vmatpush1.msra.mxu1 %v391_v33 }
  0x69   : > { %520 = vmatprep.mubr.f32.mxu0 %v1718_v36  ;;  %568 = vmatprep.mubr.f32.mxu1 %v1718_v36 }
  0x6a   : > { %1476 = vmatmul.mubr.msk.f32.vlgmr.msra.gmra.mxu0 %vm407_vm1, %v375_v34  ;;  %1484 = vmatmul.mubr.msk.f32.vlgmr.msra.gmra.mxu1 %vm407_vm1, %v383_v35 }
  0x6b   : > { %526 = vmatprep.mubr.f32.mxu0 %v1718_v36  ;;  %574 = vmatprep.mubr.f32.mxu1 %v1718_v36 }
  0x6e   : > { %1477 = vmatmul.mubr.msk.f32.gmra.mxu0 %vm407_vm1, %v376_v37  ;;  %1485 = vmatmul.mubr.msk.f32.gmra.mxu1 %vm407_vm1, %v384_v38 }
  0x6f   : > { %532 = vmatprep.mubr.f32.mxu0 %v1718_v36  ;;  %580 = vmatprep.mubr.f32.mxu1 %v1718_v36 }
  0x72   : > { %1478 = vmatmul.mubr.msk.f32.gmra.mxu0 %vm407_vm1, %v377_v39  ;;  %1486 = vmatmul.mubr.msk.f32.gmra.mxu1 %vm407_vm1, %v385_v40 }
  0x73   : > { %538 = vmatprep.mubr.f32.mxu0 %v1718_v36  ;;  %586 = vmatprep.mubr.f32.mxu1 %v1718_v36 }
  0x76   : > { %1479 = vmatmul.mubr.msk.f32.gmra.mxu0 %vm407_vm1, %v378_v41  ;;  %1487 = vmatmul.mubr.msk.f32.gmra.mxu1 %vm407_vm1, %v386_v42 }
  0x77   : > { %544 = vmatprep.mubr.f32.mxu0 %v1718_v36  ;;  %592 = vmatprep.mubr.f32.mxu1 %v1718_v36 }
  0x7a   : > { %1480 = vmatmul.mubr.msk.f32.gmra.mxu0 %vm407_vm1, %v379_v43  ;;  %1488 = vmatmul.mubr.msk.f32.gmra.mxu1 %vm407_vm1, %v387_v44 }
  0x7b   : > { %550 = vmatprep.mubr.f32.mxu0 %v1718_v36  ;;  %598 = vmatprep.mubr.f32.mxu1 %v1718_v36 }
  0x7e   : > { %1481 = vmatmul.mubr.msk.f32.gmra.mxu0 %vm407_vm1, %v380_v45  ;;  %1489 = vmatmul.mubr.msk.f32.gmra.mxu1 %vm407_vm1, %v388_v46 }
  0x7f   : > { %556 = vmatprep.mubr.f32.mxu0 %v1718_v36  ;;  %604 = vmatprep.mubr.f32.mxu1 %v1718_v36 }
  0x82   : > { %1482 = vmatmul.mubr.msk.f32.gmra.mxu0 %vm407_vm1, %v381_v47  ;;  %1490 = vmatmul.mubr.msk.f32.gmra.mxu1 %vm407_vm1, %v389_v48 }
  0x83   : > { %562 = vmatprep.mubr.f32.mxu0 %v1718_v36  ;;  %610 = vmatprep.mubr.f32.mxu1 %v1718_v36 }
  0x86   : > { %1483 = vmatmul.mubr.msk.f32.gmra.mxu0 %vm407_vm1, %v382_v49  ;;  %1491 = vmatmul.mubr.msk.f32.gmra.mxu1 %vm407_vm1, %v390_v50 }
 0x12a   : > { %v522_v58 = vpop.f32.mrf.mxu0  ;;  %v570_v59 = vpop.f32.mrf.mxu1 }
 0x12b   : > { %v1993_v62 = vsub.f32 %v1986_v56, %v522_v58  ;;  %v1999_v2 = vsub.f32 %v1986_v56, %v570_v59 }
 0x12c   : > { %v524_v60 = vpop.f32.mrf.mxu0  ;;  %v572_v61 = vpop.f32.mrf.mxu1 }
 0x12d   : > { %v1996_v63 = vsub.f32 %v1990_v57, %v524_v60  ;;  %v2002_v3 = vsub.f32 %v1990_v57, %v572_v61 }
 0x12e   : > { %v528_v0 = vpop.f32.mrf.mxu0  ;;  %v576_v1 = vpop.f32.mrf.mxu1 }
 0x12f   : > { %v2005_v4 = vsub.f32 %v1986_v56, %v576_v1  ;;  %v661_v5 = vmin.f32 %v1993_v62, %v1996_v63  ;;  %v2013_v9 = vsub.f32 %v1986_v56, %v528_v0  ;;  %v685_v15 = vmin.f32 %v1999_v2, %v2002_v3 }
 0x130   : > { %v530_v6 = vpop.f32.mrf.mxu0  ;;  %v578_v7 = vpop.f32.mrf.mxu1 }
 0x131   : > { %v2010_v8 = vsub.f32 %v1990_v57, %v578_v7  ;;  %662 = vmin.xlane.f32.xlu0 %v661_v5  ;;  %v2016_v12 = vsub.f32 %v1990_v57, %v530_v6 }
 0x132   : > { %v534_v10 = vpop.f32.mrf.mxu0  ;;  %v582_v11 = vpop.f32.mrf.mxu1 }
 0x133   : > { %v2019_v13 = vsub.f32 %v1986_v56, %v534_v10  ;;  %v688_v14 = vmin.f32 %v2005_v4, %v2010_v8  ;;  %v2029_v19 = vsub.f32 %v1986_v56, %v582_v11  ;;  %v664_v24 = vmin.f32 %v2013_v9, %v2016_v12 }
 0x134   : > { %v536_v16 = vpop.f32.mrf.mxu0  ;;  %v584_v17 = vpop.f32.mrf.mxu1 }
 0x135   : > { %v2026_v18 = vsub.f32 %v1990_v57, %v536_v16  ;;  %689 = vmin.xlane.f32.xlu1 %v688_v14  ;;  %686 = vmin.xlane.f32.xlu0 %v685_v15  ;;  %v2032_v20 = vsub.f32 %v1990_v57, %v584_v17 }
 0x136   : > { %v540_v21 = vpop.f32.mrf.mxu0  ;;  %v588_v22 = vpop.f32.mrf.mxu1 }
 0x137   : > { %v2035_v23 = vsub.f32 %v1986_v56, %v540_v21  ;;  %v667_v25 = vmin.f32 %v2019_v13, %v2026_v18  ;;  %v2042_v27 = vsub.f32 %v1986_v56, %v588_v22  ;;  %v691_v31 = vmin.f32 %v2029_v19, %v2032_v20 }
 0x138   : > { %v542_v26 = vpop.f32.mrf.mxu0  ;;  %v590_v28 = vpop.f32.mrf.mxu1 }
 0x139   : > { %v2045_v29 = vsub.f32 %v1990_v57, %v542_v26  ;;  %665 = vmin.xlane.f32.xlu0 %v664_v24  ;;  %668 = vmin.xlane.f32.xlu1 %v667_v25  ;;  %v2048_v30 = vsub.f32 %v1990_v57, %v590_v28 }
 0x13a   : > { %v546_v32 = vpop.f32.mrf.mxu0  ;;  %v594_v33 = vpop.f32.mrf.mxu1 }
 0x13b   : > { %v2053_v34 = vsub.f32 %v1986_v56, %v546_v32  ;;  %v670_v35 = vmin.f32 %v2035_v23, %v2045_v29  ;;  %v2058_v37 = vsub.f32 %v1986_v56, %v594_v33  ;;  %v694_v41 = vmin.f32 %v2042_v27, %v2048_v30  ;;  %v2133_v33 = vld [vmem:[#allocation2] sm:$0xff] }
 0x13c   : > { %v548_v36 = vpop.f32.mrf.mxu0  ;;  %v596_v38 = vpop.f32.mrf.mxu1 }
 0x13d   : > { %v2061_v39 = vsub.f32 %v1990_v57, %v548_v36  ;;  %692 = vmin.xlane.f32.xlu0 %v691_v31  ;;  %671 = vmin.xlane.f32.xlu1 %v670_v35  ;;  %v2064_v40 = vsub.f32 %v1990_v57, %v596_v38  ;;  %v741_v31 = vld [vmem:[%s336_s28] sm:$0x3] }
 0x13e   : > { %v552_v42 = vpop.f32.mrf.mxu0  ;;  %v600_v43 = vpop.f32.mrf.mxu1  ;;  %v2131_v32 = vrot.slane %v741_v31, %v625_v54  ;;  %v2148_v54 = vld [vmem:[#allocation2 + $0x48] sm:$0xff] }
 0x13f   : > { %v2069_v44 = vsub.f32 %v1986_v56, %v552_v42  ;;  %v673_v45 = vmin.f32 %v2053_v34, %v2061_v39  ;;  %v2074_v47 = vsub.f32 %v1986_v56, %v600_v43  ;;  %v697_v55 = vmin.f32 %v2058_v37, %v2064_v40 }
 0x140   : > { %v554_v46 = vpop.f32.mrf.mxu0  ;;  %v602_v48 = vpop.f32.mrf.mxu1 }
 0x141   : > { %v2077_v49 = vsub.f32 %v1990_v57, %v554_v46  ;;  %695 = vmin.xlane.f32.xlu1 %v694_v41  ;;  %674 = vmin.xlane.f32.xlu0 %v673_v45  ;;  %v2080_v50 = vsub.f32 %v1990_v57, %v602_v48  ;;  %v2178_v45 = vld [vmem:[#allocation2 + $0x8] sm:$0xff]  ;;  %v2187_v48 = vld [vmem:[#allocation2 + $0x10] sm:$0xff] }
 0x142   : > { %v558_v58 = vpop.f32.mrf.mxu0  ;;  %v606_v59 = vpop.f32.mrf.mxu1 }
 0x143   : > { %v2085_v60 = vsub.f32 %v1986_v56, %v558_v58  ;;  %v676_v61 = vmin.f32 %v2069_v44, %v2077_v49  ;;  %v2090_v1 = vsub.f32 %v1986_v56, %v606_v59  ;;  %v700_v10 = vmin.f32 %v2074_v47, %v2080_v50 }
 0x144   : > { %v560_v0 = vpop.f32.mrf.mxu0  ;;  %v608_v5 = vpop.f32.mrf.mxu1 }
 0x145   : > { %v2093_v6 = vsub.f32 %v1990_v57, %v560_v0  ;;  %698 = vmin.xlane.f32.xlu0 %v697_v55  ;;  %677 = vmin.xlane.f32.xlu1 %v676_v61  ;;  %v2096_v7 = vsub.f32 %v1990_v57, %v608_v5 }
 0x146   : > { %v564_v11 = vpop.f32.mrf.mxu0  ;;  %v612_v14 = vpop.f32.mrf.mxu1 }
 0x147   : > { %v2101_v15 = vsub.f32 %v1986_v56, %v564_v11  ;;  %v679_v16 = vmin.f32 %v2085_v60, %v2093_v6  ;;  %v2106_v21 = vsub.f32 %v1986_v56, %v612_v14  ;;  %v703_v26 = vmin.f32 %v2090_v1, %v2096_v7  ;;  %v2234_v11 = vld [vmem:[#allocation2 + $0x18] sm:$0xff] }
 0x148   : > { %v566_v17 = vpop.f32.mrf.mxu0  ;;  %v614_v22 = vpop.f32.mrf.mxu1 }
 0x149   : > { %v2109_v24 = vsub.f32 %v1990_v57, %v566_v17  ;;  %701 = vmin.xlane.f32.xlu1 %v700_v10  ;;  %680 = vmin.xlane.f32.xlu0 %v679_v16  ;;  %v2112_v25 = vsub.f32 %v1990_v57, %v614_v22  ;;  %v2127_v57 = vrot.slane %v741_v31, %v621_v53  ;;  %v2275_v31 = vld [vmem:[#allocation2 + $0x20] sm:$0xff] }
 0x14b   : > { %v682_v28 = vmin.f32 %v2101_v15, %v2109_v24  ;;  %v706_v56 = vmin.f32 %v2106_v21, %v2112_v25 }
 0x14d   : > { %704 = vmin.xlane.f32.xlu0 %v703_v26  ;;  %683 = vmin.xlane.f32.xlu1 %v682_v28 }
 0x151   : > { %707 = vmin.xlane.f32.xlu1 %v706_v56  ;;  %v2267_v56 = vld [vmem:[#allocation2 + $0x58] sm:$0xff] }
 0x152   : > { %2889 = vst [vmem:[#allocation13_spill] sm:$0xff] %v2267_v56 }
 0x1ba   : > { %v2135_v35 = vpop.xlane.xlu0 %662 }
 0x1bb   : > { %vm709_vm3 = vcmp.eq.f32.partialorder %v1993_v62, %v2135_v35  ;;  %vm710_vm4 = vcmp.eq.f32.partialorder %v1996_v63, %v2135_v35  ;;  %vm1054_vm5 = vcmp.lt.f32.partialorder %v2135_v35, %v2133_v33  ;;  %v2153_v62 = vld [vmem:[#allocation2 + $0x40] sm:$0xff] }
 0x1bc   : > { %v1135_v53 = vsel %vm1054_vm5, %v2135_v35, %v2133_v33  ;;  %v750_v36 = vsel %vm709_vm3, %v2127_v57, 2147483647  ;;  %v751_v38 = vsel %vm710_vm4, %v2131_v32, 2147483647  ;;  %v1072_v33 = vld [vmem:[#allocation3 + $0x10] sm:$0xff] }
 0x1bd   : > { %1151 = vst.msk [vmem:[#allocation2] sm:$0xff] %vm1102_vm2, %v1135_v53  ;;  %vm782_vm6 = vcmp.lt.s32.totalorder %v750_v36, %v751_v38 }
 0x1be   : > { %v2155_v63 = vpop.xlane.xlu1 %689  ;;  %v2157_v41 = vpop.xlane.xlu0 %686  ;;  %v2159_v42 = vsel %vm782_vm6, %v750_v36, %v751_v38 }
 0x1bf   : > { %vm727_vm7 = vcmp.eq.f32.partialorder %v2005_v4, %v2155_v63  ;;  %vm728_vm8 = vcmp.eq.f32.partialorder %v2010_v8, %v2155_v63  ;;  %vm2860_vm9 = vcmp.lt.f32.partialorder %v2155_v63, %v2148_v54  ;;  %vm725_vm10 = vcmp.eq.f32.partialorder %v1999_v2, %v2157_v41  ;;  %v2224_v8 = vld [vmem:[#allocation2 + $0x50] sm:$0xff] }
 0x1c0   : > { %v1144_v43 = vsel %vm2860_vm9, %v2155_v63, %v2148_v54  ;;  %vm726_vm11 = vcmp.eq.f32.partialorder %v2002_v3, %v2157_v41  ;;  %vm1062_vm12 = vcmp.lt.f32.partialorder %v2157_v41, %v2153_v62  ;;  %v785_v46 = vshra.s32 %v2159_v42, 16 }
 0x1c1   : > { %1160 = vst.msk [vmem:[#allocation2 + $0x48] sm:$0xff] %vm1102_vm2, %v1144_v43  ;;  %v1143_v2 = vsel %vm1062_vm12, %v2157_v41, %v2153_v62  ;;  %v766_v55 = vsel %vm725_vm10, %v2127_v57, 2147483647  ;;  %v767_v3 = vsel %vm726_vm11, %v2131_v32, 2147483647 }
 0x1c2   : > { %1159 = vst.msk [vmem:[#allocation2 + $0x40] sm:$0xff] %vm1102_vm2, %v1143_v2  ;;  %v2192_v58 = vpop.xlane.xlu0 %665  ;;  %v2194_v59 = vpop.xlane.xlu1 %668  ;;  %v2196_v61 = vcvt.s32.f32 %v785_v46  ;;  %vm910_vm13 = vcmp.lt.s32.totalorder %v766_v55, %v767_v3  ;;  %v768_v0 = vsel %vm727_vm7, %v2127_v57, 2147483647  ;;  %v769_v5 = vsel %vm728_vm8, %v2131_v32, 2147483647 }
 0x1c3   : > { %vm711_vm14 = vcmp.eq.f32.partialorder %v2013_v9, %v2192_v58  ;;  %vm712_vm15 = vcmp.eq.f32.partialorder %v2016_v12, %v2192_v58  ;;  %vm2870_vm0 = vcmp.lt.f32.partialorder %v2192_v58, %v2178_v45  ;;  %vm713_vm1 = vcmp.eq.f32.partialorder %v2019_v13, %v2194_v59 }
 0x1c4   : > { %v1136_v4 = vsel %vm2870_vm0, %v2192_v58, %v2178_v45  ;;  %vm714_vm3 = vcmp.eq.f32.partialorder %v2026_v18, %v2194_v59  ;;  %vm2871_vm4 = vcmp.lt.f32.partialorder %v2194_v59, %v2187_v48  ;;  %788 = vmin.xlane.f32.xlu0 %v2196_v61  ;;  %v2226_v10 = vsel %vm910_vm13, %v766_v55, %v767_v3 }
 0x1c5   : > { %1152 = vst.msk [vmem:[#allocation2 + $0x8] sm:$0xff] %vm1102_vm2, %v1136_v4  ;;  %v1137_v13 = vsel %vm2871_vm4, %v2194_v59, %v2187_v48  ;;  %v913_v18 = vshra.s32 %v2226_v10, 16  ;;  %v754_v14 = vsel %vm713_vm1, %v2127_v57, 2147483647  ;;  %v755_v16 = vsel %vm714_vm3, %v2131_v32, 2147483647 }
 0x1c6   : > { %1153 = vst.msk [vmem:[#allocation2 + $0x10] sm:$0xff] %vm1102_vm2, %v1137_v13  ;;  %v2240_v17 = vpop.xlane.xlu0 %692  ;;  %v2242_v22 = vpop.xlane.xlu1 %671  ;;  %vm814_vm6 = vcmp.lt.s32.totalorder %v754_v14, %v755_v16  ;;  %v752_v26 = vsel %vm711_vm14, %v2127_v57, 2147483647  ;;  %v753_v28 = vsel %vm712_vm15, %v2131_v32, 2147483647  ;;  %vm926_vm7 = vcmp.lt.s32.totalorder %v768_v0, %v769_v5 }
 0x1c7   : > { %vm729_vm8 = vcmp.eq.f32.partialorder %v2029_v19, %v2240_v17  ;;  %vm730_vm10 = vcmp.eq.f32.partialorder %v2032_v20, %v2240_v17  ;;  %vm2862_vm11 = vcmp.lt.f32.partialorder %v2240_v17, %v2224_v8  ;;  %vm2853_vm13 = vcmp.lt.f32.partialorder %v2242_v22, %v2234_v11 }
 0x1c8   : > { %v1145_v9 = vsel %vm2862_vm11, %v2240_v17, %v2224_v8  ;;  %v2265_v12 = vcvt.s32.f32 %v913_v18  ;;  %v1138_v19 = vsel %vm2853_vm13, %v2242_v22, %v2234_v11  ;;  %v2277_v53 = vsel %vm814_vm6, %v754_v14, %v755_v16  ;;  %v2326_v18 = vld [vmem:[#allocation2 + $0x28] sm:$0xff] }
 0x1c9   : > { %1161 = vst.msk [vmem:[#allocation2 + $0x50] sm:$0xff] %vm1102_vm2, %v1145_v9  ;;  %vm798_vm14 = vcmp.lt.s32.totalorder %v752_v26, %v753_v28  ;;  %v770_v36 = vsel %vm729_vm8, %v2127_v57, 2147483647  ;;  %1154 = vst.msk [vmem:[#allocation2 + $0x18] sm:$0xff] %vm1102_vm2, %v1138_v19  ;;  %v817_v46 = vshra.s32 %v2277_v53, 16  ;;  %v2294_v3 = vsel %vm926_vm7, %v768_v0, %v769_v5  ;;  %v2315_v5 = vld [vmem:[#allocation2 + $0x60] sm:$0xff] }
 0x1ca   : > { %916 = vmin.xlane.f32.xlu0 %v2265_v12  ;;  %v2282_v38 = vpop.xlane.xlu1 %695  ;;  %v2284_v43 = vpop.xlane.xlu0 %674  ;;  %v2287_v2 = vsel %vm798_vm14, %v752_v26, %v753_v28  ;;  %v771_v55 = vsel %vm730_vm10, %v2131_v32, 2147483647  ;;  %vm715_vm15 = vcmp.eq.f32.partialorder %v2035_v23, %v2242_v22  ;;  %vm716_vm1 = vcmp.eq.f32.partialorder %v2045_v29, %v2242_v22  ;;  %2890 = vst [vmem:[#allocation14_spill] sm:$0xff] %v2315_v5 }
 0x1cb   : > { %vm2852_vm3 = vcmp.lt.f32.partialorder %v2282_v38, %v2267_v56  ;;  %vm717_vm6 = vcmp.eq.f32.partialorder %v2053_v34, %v2284_v43  ;;  %vm718_vm7 = vcmp.eq.f32.partialorder %v2061_v39, %v2284_v43  ;;  %vm2854_vm8 = vcmp.lt.f32.partialorder %v2284_v43, %v2275_v31  ;;  %2891 = vst [vmem:[#allocation15_spill] sm:$0xff] %v2326_v18  ;;  %v2362_v39 = vld [vmem:[#allocation2 + $0x68] sm:$0xff] }
 0x1cc   : > { %v1146_v20 = vsel %vm2852_vm3, %v2282_v38, %v2267_v56  ;;  %v2313_v0 = vcvt.s32.f32 %v817_v46  ;;  %vm731_vm10 = vcmp.eq.f32.partialorder %v2042_v27, %v2282_v38  ;;  %v1139_v4 = vsel %vm2854_vm8, %v2284_v43, %v2275_v31  ;;  %2893 = vst [vmem:[#allocation17_spill] sm:$0xff] %v2362_v39 }
 0x1cd   : > { %1162 = vst.msk [vmem:[#allocation2 + $0x58] sm:$0xff] %vm1102_vm2, %v1146_v20  ;;  %v801_v13 = vshra.s32 %v2287_v2, 16  ;;  %vm942_vm14 = vcmp.lt.s32.totalorder %v770_v36, %v771_v55  ;;  %1155 = vst.msk [vmem:[#allocation2 + $0x20] sm:$0xff] %vm1102_vm2, %v1139_v4  ;;  %v929_v28 = vshra.s32 %v2294_v3, 16  ;;  %v758_v9 = vsel %vm717_vm6, %v2127_v57, 2147483647 }
 0x1ce   : > { %820 = vmin.xlane.f32.xlu0 %v2313_v0  ;;  %v2330_v14 = vpop.xlane.xlu0 %698  ;;  %v2332_v16 = vpop.xlane.xlu1 %677  ;;  %v2334_v26 = vsel %vm942_vm14, %v770_v36, %v771_v55  ;;  %v759_v19 = vsel %vm718_vm7, %v2131_v32, 2147483647  ;;  %vm732_vm8 = vcmp.eq.f32.partialorder %v2048_v30, %v2282_v38  ;;  %v756_v36 = vsel %vm715_vm15, %v2127_v57, 2147483647  ;;  %v2378_v4 = vld [vmem:[#allocation2 + $0x30] sm:$0xff] }
 0x1cf   : > { %2892 = vst [vmem:[#allocation16_spill] sm:$0xff] %v2330_v14  ;;  %v2345_v46 = vcvt.s32.f32 %v801_v13  ;;  %vm733_vm3 = vcmp.eq.f32.partialorder %v2058_v37, %v2330_v14  ;;  %vm734_vm14 = vcmp.eq.f32.partialorder %v2064_v40, %v2330_v14  ;;  %vm2855_vm13 = vcmp.lt.f32.partialorder %v2330_v14, %v2315_v5  ;;  %2894 = vst [vmem:[#allocation18_spill] sm:$0xff] %v2378_v4 }
 0x1d0   : > { %v1147_v34 = vsel %vm2855_vm13, %v2330_v14, %v2315_v5  ;;  %vm2859_vm6 = vcmp.lt.f32.partialorder %v2332_v16, %v2326_v18  ;;  %vm719_vm7 = vcmp.eq.f32.partialorder %v2069_v44, %v2332_v16  ;;  %v945_v20 = vshra.s32 %v2334_v26, 16 }
 0x1d1   : > { %804 = vmin.xlane.f32.xlu1 %v2345_v46  ;;  %1163 = vst.msk [vmem:[#allocation2 + $0x60] sm:$0xff] %vm1102_vm2, %v1147_v34  ;;  %v1140_v55 = vsel %vm2859_vm6, %v2332_v16, %v2326_v18  ;;  %vm846_vm13 = vcmp.lt.s32.totalorder %v758_v9, %v759_v19  ;;  %v757_v51 = vsel %vm716_vm1, %v2131_v32, 2147483647  ;;  %v774_v52 = vsel %vm733_vm3, %v2127_v57, 2147483647 }
 0x1d2   : > { %1156 = vst.msk [vmem:[#allocation2 + $0x28] sm:$0xff] %vm1102_vm2, %v1140_v55  ;;  %v2381_v23 = vpop.xlane.xlu1 %701  ;;  %v2383_v13 = vpop.xlane.xlu0 %680  ;;  %v2385_v34 = vsel %vm846_vm13, %v758_v9, %v759_v19  ;;  %v775_v55 = vsel %vm734_vm14, %v2131_v32, 2147483647  ;;  %vm720_vm15 = vcmp.eq.f32.partialorder %v2077_v49, %v2332_v16  ;;  %v2401_v9 = vcvt.s32.f32 %v945_v20  ;;  %v2433_v20 = vld [vmem:[#allocation2 + $0x38] sm:$0xff] }
 0x1d3   : > { %v2403_v19 = vcvt.s32.f32 %v929_v28  ;;  %vm2861_vm13 = vcmp.lt.f32.partialorder %v2381_v23, %v2362_v39  ;;  %vm735_vm1 = vcmp.eq.f32.partialorder %v2074_v47, %v2381_v23  ;;  %vm736_vm3 = vcmp.eq.f32.partialorder %v2080_v50, %v2381_v23  ;;  %v2431_v28 = vld [vmem:[#allocation2 + $0x70] sm:$0xff]  ;;  %2896 = vst [vmem:[#allocation20_spill] sm:$0xff] %v2433_v20 }
 0x1d4   : > { %v1148_v29 = vsel %vm2861_vm13, %v2381_v23, %v2362_v39  ;;  %vm721_vm14 = vcmp.eq.f32.partialorder %v2085_v60, %v2383_v13  ;;  %vm722_vm6 = vcmp.eq.f32.partialorder %v2093_v6, %v2383_v13  ;;  %vm2869_vm9 = vcmp.lt.f32.partialorder %v2383_v13, %v2378_v4  ;;  %948 = vmin.xlane.f32.xlu0 %v2401_v9 }
 0x1d5   : > { %932 = vmin.xlane.f32.xlu1 %v2403_v19  ;;  %1164 = vst.msk [vmem:[#allocation2 + $0x68] sm:$0xff] %vm1102_vm2, %v1148_v29  ;;  %v1141_v37 = vsel %vm2869_vm9, %v2383_v13, %v2378_v4  ;;  %v849_v40 = vshra.s32 %v2385_v34, 16  ;;  %vm830_vm13 = vcmp.lt.s32.totalorder %v756_v36, %v757_v51  ;;  %2895 = vst [vmem:[#allocation19_spill] sm:$0xff] %v2431_v28  ;;  %v772_v4 = vsel %vm731_vm10, %v2127_v57, 2147483647 }
 0x1d6   : > { %vm974_vm11 = vcmp.lt.s32.totalorder %v774_v52, %v775_v55  ;;  %1157 = vst.msk [vmem:[#allocation2 + $0x30] sm:$0xff] %vm1102_vm2, %v1141_v37  ;;  %v2436_v39 = vsel %vm830_vm13, %v756_v36, %v757_v51  ;;  %v2438_v18 = vpop.xlane.xlu0 %704  ;;  %v2440_v29 = vpop.xlane.xlu1 %683  ;;  %v773_v5 = vsel %vm732_vm8, %v2131_v32, 2147483647  ;;  %v761_v44 = vsel %vm720_vm15, %v2131_v32, 2147483647 }
 0x1d7   : > { %v2442_v56 = vsel %vm974_vm11, %v774_v52, %v775_v55  ;;  %v2452_v14 = vcvt.s32.f32 %v849_v40  ;;  %v833_v51 = vshra.s32 %v2436_v39, 16  ;;  %vm737_vm13 = vcmp.eq.f32.partialorder %v2090_v1, %v2438_v18  ;;  %v2481_v55 = vld [vmem:[#allocation2 + $0x78] sm:$0xff] }
 0x1d8   : > { %vm738_vm11 = vcmp.eq.f32.partialorder %v2096_v7, %v2438_v18  ;;  %vm2874_vm9 = vcmp.lt.f32.partialorder %v2438_v18, %v2431_v28  ;;  %vm723_vm10 = vcmp.eq.f32.partialorder %v2101_v15, %v2440_v29  ;;  %vm724_vm0 = vcmp.eq.f32.partialorder %v2109_v24, %v2440_v29  ;;  %2897 = vst [vmem:[#allocation21_spill] sm:$0xff] %v2481_v55 }
 0x1d9   : > { %vm2873_vm8 = vcmp.lt.f32.partialorder %v2440_v29, %v2433_v20  ;;  %852 = vmin.xlane.f32.xlu0 %v2452_v14  ;;  %v2468_v52 = vcvt.s32.f32 %v833_v51  ;;  %v1149_v27 = vsel %vm2874_vm9, %v2438_v18, %v2431_v28  ;;  %v977_v36 = vshra.s32 %v2442_v56, 16 }
 0x1da   : > { %v1142_v30 = vsel %vm2873_vm8, %v2440_v29, %v2433_v20  ;;  %1165 = vst.msk [vmem:[#allocation2 + $0x70] sm:$0xff] %vm1102_vm2, %v1149_v27  ;;  %vm958_vm4 = vcmp.lt.s32.totalorder %v772_v4, %v773_v5  ;;  %v2485_v37 = vpop.xlane.xlu1 %707  ;;  %v762_v40 = vsel %vm721_vm14, %v2127_v57, 2147483647  ;;  %v763_v51 = vsel %vm722_vm6, %v2131_v32, 2147483647 }
 0x1db   : > { %1158 = vst.msk [vmem:[#allocation2 + $0x38] sm:$0xff] %vm1102_vm2, %v1142_v30  ;;  %2898 = vst [vmem:[#allocation22_spill] sm:$0xff] %v2485_v37  ;;  %v760_v27 = vsel %vm719_vm7, %v2127_v57, 2147483647  ;;  %836 = vmin.xlane.f32.xlu1 %v2468_v52  ;;  %v2500_v30 = vcvt.s32.f32 %v977_v36  ;;  %v2502_v20 = vsel %vm958_vm4, %v772_v4, %v773_v5  ;;  %vm739_vm8 = vcmp.eq.f32.partialorder %v2106_v21, %v2485_v37 }
 0x1dc   : > { %vm740_vm14 = vcmp.eq.f32.partialorder %v2112_v25, %v2485_v37  ;;  %v961_v60 = vshra.s32 %v2502_v20, 16  ;;  %vm1069_vm6 = vcmp.lt.f32.partialorder %v2485_v37, %v2481_v55  ;;  %vm878_vm9 = vcmp.lt.s32.totalorder %v762_v40, %v763_v51 }
 0x1dd   : > { %980 = vmin.xlane.f32.xlu0 %v2500_v30  ;;  %v1150_v6 = vsel %vm1069_vm6, %v2485_v37, %v2481_v55  ;;  %v2521_v5 = vsel %vm878_vm9, %v762_v40, %v763_v51  ;;  %vm862_vm4 = vcmp.lt.s32.totalorder %v760_v27, %v761_v44  ;;  %v778_v4 = vsel %vm737_vm13, %v2127_v57, 2147483647 }
 0x1de   : > { %v2527_v36 = vcvt.s32.f32 %v961_v60  ;;  %1166 = vst.msk [vmem:[#allocation2 + $0x78] sm:$0xff] %vm1102_vm2, %v1150_v6  ;;  %v881_v49 = vshra.s32 %v2521_v5, 16  ;;  %v2531_v28 = vsel %vm862_vm4, %v760_v27, %v761_v44  ;;  %v779_v40 = vsel %vm738_vm11, %v2131_v32, 2147483647 }
 0x1df   : > { %v865_v51 = vshra.s32 %v2531_v28, 16  ;;  %vm1006_vm9 = vcmp.lt.s32.totalorder %v778_v4, %v779_v40  ;;  %v776_v1 = vsel %vm735_vm1, %v2127_v57, 2147483647  ;;  %v777_v60 = vsel %vm736_vm3, %v2131_v32, 2147483647 }
 0x1e0   : > { %964 = vmin.xlane.f32.xlu1 %v2527_v36  ;;  %v2547_v27 = vcvt.s32.f32 %v881_v49  ;;  %v2549_v44 = vsel %vm1006_vm9, %v778_v4, %v779_v40  ;;  %vm990_vm7 = vcmp.lt.s32.totalorder %v776_v1, %v777_v60  ;;  %v764_v7 = vsel %vm723_vm10, %v2127_v57, 2147483647 }
 0x1e1   : > { %v2555_v6 = vcvt.s32.f32 %v865_v51  ;;  %v1009_v47 = vshra.s32 %v2549_v44, 16  ;;  %v2558_v55 = vsel %vm990_vm7, %v776_v1, %v777_v60  ;;  %v765_v50 = vsel %vm724_vm0, %v2131_v32, 2147483647 }
 0x1e2   : > { %884 = vmin.xlane.f32.xlu0 %v2547_v27  ;;  %v993_v4 = vshra.s32 %v2558_v55, 16  ;;  %vm894_vm15 = vcmp.lt.s32.totalorder %v764_v7, %v765_v50  ;;  %v780_v15 = vsel %vm739_vm8, %v2127_v57, 2147483647  ;;  %v781_v49 = vsel %vm740_vm14, %v2131_v32, 2147483647 }
 0x1e3   : > { %v2574_v40 = vcvt.s32.f32 %v1009_v47  ;;  %v2576_v51 = vsel %vm894_vm15, %v764_v7, %v765_v50  ;;  %vm1022_vm0 = vcmp.lt.s32.totalorder %v780_v15, %v781_v49  ;;  %v784_v60 = vand.u32 65535, %v2159_v42 }
 0x1e4   : > { %868 = vmin.xlane.f32.xlu1 %v2555_v6  ;;  %v2579_v24 = vsel %vm1022_vm0, %v780_v15, %v781_v49  ;;  %v2582_v1 = vcvt.s32.f32 %v993_v4  ;;  %v897_v21 = vshra.s32 %v2576_v51, 16  ;;  %v912_v4 = vand.u32 65535, %v2226_v10 }
 0x1e5   : > { %v1025_v25 = vshra.s32 %v2579_v24, 16  ;;  %v786_v47 = vcvt.s32.f32 %v784_v60  ;;  %v800_v42 = vand.u32 65535, %v2287_v2 }
 0x1e6   : > { %1012 = vmin.xlane.f32.xlu0 %v2574_v40  ;;  %v2586_v57 = vcvt.s32.f32 %v897_v21  ;;  %v914_v49 = vcvt.s32.f32 %v912_v4  ;;  %v816_v21 = vand.u32 65535, %v2277_v53  ;;  %v944_v53 = vand.u32 65535, %v2334_v26 }
 0x1e7   : > { %v2590_v32 = vcvt.s32.f32 %v1025_v25 }
 0x1e8   : > { %996 = vmin.xlane.f32.xlu1 %v2582_v1  ;;  %v818_v37 = vcvt.s32.f32 %v816_v21 }
 0x1ec   : > { %900 = vmin.xlane.f32.xlu1 %v2586_v57 }
 0x1f0   : > { %1028 = vmin.xlane.f32.xlu1 %v2590_v32 }
 0x24d   : > { %v2594_v7 = vpop.xlane.xlu0 %788 }
 0x24e   : > { %vm790_vm1 = vcmp.eq.f32.partialorder %v2196_v61, %v2594_v7 }
 0x24f   : > { %v791_v50 = vsel %vm790_vm1, %v786_v47, inf  ;;  %v802_v47 = vcvt.s32.f32 %v800_v42  ;;  %v976_v42 = vand.u32 65535, %v2442_v56  ;;  %v880_v56 = vand.u32 65535, %v2521_v5 }
 0x250   : > { %792 = vmin.xlane.f32.xlu0 %v791_v50  ;;  %v928_v50 = vand.u32 65535, %v2294_v3 }
 0x253   : > { %v2599_v15 = vpop.xlane.xlu0 %916 }
 0x254   : > { %vm918_vm3 = vcmp.eq.f32.partialorder %v2265_v12, %v2599_v15 }
 0x255   : > { %v919_v25 = vsel %vm918_vm3, %v914_v49, inf  ;;  %v946_v49 = vcvt.s32.f32 %v944_v53  ;;  %v978_v53 = vcvt.s32.f32 %v976_v42  ;;  %v896_v42 = vand.u32 65535, %v2576_v51 }
 0x256   : > { %920 = vmin.xlane.f32.xlu0 %v919_v25 }
 0x257   : > { %v2605_v60 = vpop.xlane.xlu0 %820 }
 0x258   : > { %vm822_vm13 = vcmp.eq.f32.partialorder %v2313_v0, %v2605_v60  ;;  %v930_v0 = vcvt.s32.f32 %v928_v50 }
 0x259   : > { %v823_v61 = vsel %vm822_vm13, %v818_v37, inf  ;;  %v848_v37 = vand.u32 65535, %v2385_v34 }
 0x25a   : > { %v2609_v10 = vpop.xlane.xlu1 %804  ;;  %824 = vmin.xlane.f32.xlu0 %v823_v61 }
 0x25b   : > { %vm806_vm11 = vcmp.eq.f32.partialorder %v2345_v46, %v2609_v10  ;;  %v832_v46 = vand.u32 65535, %v2436_v39  ;;  %v850_v25 = vcvt.s32.f32 %v848_v37  ;;  %v960_v39 = vand.u32 65535, %v2502_v20 }
 0x25c   : > { %v807_v12 = vsel %vm806_vm11, %v802_v47, inf  ;;  %v1008_v37 = vand.u32 65535, %v2549_v44 }
 0x25d   : > { %808 = vmin.xlane.f32.xlu1 %v807_v12  ;;  %v2615_v2 = vpop.xlane.xlu0 %948  ;;  %v834_v61 = vcvt.s32.f32 %v832_v46  ;;  %v962_v12 = vcvt.s32.f32 %v960_v39 }
 0x25e   : > { %v2617_v4 = vpop.xlane.xlu1 %932  ;;  %vm950_vm10 = vcmp.eq.f32.partialorder %v2401_v9, %v2615_v2  ;;  %v1010_v46 = vcvt.s32.f32 %v1008_v37  ;;  %v955_v35 = vcvt.f32.s32 %v2615_v2 }
 0x25f   : > { %vm934_vm8 = vcmp.eq.f32.partialorder %v2403_v19, %v2617_v4  ;;  %v951_v3 = vsel %vm950_vm10, %v946_v49, inf  ;;  %v864_v49 = vand.u32 65535, %v2531_v28  ;;  %vm2901_vm10 = vcmp.lt.f32.partialorder %v2240_v17, %v2224_v8 }
 0x260   : > { %v935_v26 = vsel %vm934_vm8, %v930_v0, inf  ;;  %952 = vmin.xlane.f32.xlu0 %v951_v3  ;;  %v882_v0 = vcvt.s32.f32 %v880_v56  ;;  %v956_v41 = vshll.u32 %v955_v35, 16  ;;  %vm2902_vm8 = vcmp.lt.f32.partialorder %v2155_v63, %v2148_v54 }
 0x261   : > { %936 = vmin.xlane.f32.xlu1 %v935_v26  ;;  %v866_v3 = vcvt.s32.f32 %v864_v49  ;;  %v992_v26 = vand.u32 65535, %v2558_v55 }
 0x262   : > { %v2625_v21 = vpop.xlane.xlu0 %852 }
 0x263   : > { %vm854_vm14 = vcmp.eq.f32.partialorder %v2452_v14, %v2625_v21 }
 0x264   : > { %v2630_v34 = vpop.xlane.xlu1 %836  ;;  %v855_v9 = vsel %vm854_vm14, %v850_v25, inf  ;;  %v994_v25 = vcvt.s32.f32 %v992_v26  ;;  %vm2903_vm14 = vcmp.lt.f32.partialorder %v2284_v43, %v2275_v31  ;;  %v2905_v43 = vld [vmem:[#allocation16_spill] sm:$0xff] }
 0x265   : > { %856 = vmin.xlane.f32.xlu0 %v855_v9  ;;  %vm838_vm4 = vcmp.eq.f32.partialorder %v2468_v52, %v2630_v34  ;;  %v898_v9 = vcvt.s32.f32 %v896_v42  ;;  %v939_v42 = vcvt.f32.s32 %v2617_v4 }
 0x266   : > { %v839_v19 = vsel %vm838_vm4, %v834_v61, inf  ;;  %v2635_v47 = vpop.xlane.xlu0 %980  ;;  %v1024_v61 = vand.u32 65535, %v2579_v24  ;;  %v923_v24 = vcvt.f32.s32 %v2599_v15  ;;  %vm2904_vm4 = vcmp.lt.f32.partialorder %v2242_v22, %v2234_v11 }
 0x267   : > { %840 = vmin.xlane.f32.xlu1 %v839_v19  ;;  %vm982_vm9 = vcmp.eq.f32.partialorder %v2500_v30, %v2635_v47  ;;  %v940_v2 = vshll.u32 %v939_v42, 16 }
 0x268   : > { %v983_v14 = vsel %vm982_vm9, %v978_v53, inf  ;;  %v1026_v19 = vcvt.s32.f32 %v1024_v61  ;;  %v859_v61 = vcvt.f32.s32 %v2625_v21  ;;  %v987_v21 = vcvt.f32.s32 %v2635_v47 }
 0x269   : > { %v2640_v50 = vpop.xlane.xlu1 %964  ;;  %984 = vmin.xlane.f32.xlu0 %v983_v14 }
 0x26a   : > { %vm966_vm7 = vcmp.eq.f32.partialorder %v2527_v36, %v2640_v50  ;;  %v971_v47 = vcvt.f32.s32 %v2640_v50  ;;  %v988_v8 = vshll.u32 %v987_v21, 16 }
 0x26b   : > { %v967_v20 = vsel %vm966_vm7, %v962_v12, inf  ;;  %v2645_v52 = vpop.xlane.xlu0 %884  ;;  %v1070_v12 = vld [vmem:[#allocation3] sm:$0xff] }
 0x26c   : > { %968 = vmin.xlane.f32.xlu1 %v967_v20  ;;  %vm886_vm15 = vcmp.eq.f32.partialorder %v2547_v27, %v2645_v52 }
 0x26d   : > { %v2650_v30 = vpop.xlane.xlu1 %868  ;;  %v887_v5 = vsel %vm886_vm15, %v882_v0, inf  ;;  %v924_v0 = vshll.u32 %v923_v24, 16 }
 0x26e   : > { %888 = vmin.xlane.f32.xlu0 %v887_v5  ;;  %vm870_vm0 = vcmp.eq.f32.partialorder %v2555_v6, %v2650_v30  ;;  %v1078_v5 = vld [vmem:[#allocation3 + $0x40] sm:$0xff] }
 0x26f   : > { %v871_v28 = vsel %vm870_vm0, %v866_v3, inf  ;;  %v2655_v36 = vpop.xlane.xlu0 %1012  ;;  %v811_v3 = vcvt.f32.s32 %v2609_v10 }
 0x270   : > { %872 = vmin.xlane.f32.xlu1 %v871_v28  ;;  %vm1014_vm1 = vcmp.eq.f32.partialorder %v2574_v40, %v2655_v36 }
 0x271   : > { %v2659_v44 = vpop.xlane.xlu1 %996  ;;  %v1015_v27 = vsel %vm1014_vm1, %v1010_v46, inf }
 0x272   : > { %1016 = vmin.xlane.f32.xlu0 %v1015_v27  ;;  %vm998_vm3 = vcmp.eq.f32.partialorder %v2582_v1, %v2659_v44  ;;  %v795_v1 = vcvt.f32.s32 %v2594_v7  ;;  %v1003_v42 = vcvt.f32.s32 %v2659_v44 }
 0x273   : > { %v999_v55 = vsel %vm998_vm3, %v994_v25, inf }
 0x274   : > { %1000 = vmin.xlane.f32.xlu1 %v999_v55  ;;  %v796_v56 = vshll.u32 %v795_v1, 16 }
 0x275   : > { %v2664_v6 = vpop.xlane.xlu1 %900 }
 0x276   : > { %vm902_vm13 = vcmp.eq.f32.partialorder %v2586_v57, %v2664_v6 }
 0x277   : > { %v903_v40 = vsel %vm902_vm13, %v898_v9, inf  ;;  %v1071_v9 = vld [vmem:[#allocation3 + $0x8] sm:$0xff] }
 0x278   : > { %904 = vmin.xlane.f32.xlu1 %v903_v40 }
 0x279   : > { %v2669_v39 = vpop.xlane.xlu1 %1028 }
 0x27a   : > { %vm1030_vm11 = vcmp.eq.f32.partialorder %v2590_v32, %v2669_v39  ;;  %v827_v32 = vcvt.f32.s32 %v2605_v60  ;;  %v812_v60 = vshll.u32 %v811_v3, 16  ;;  %v1082_v3 = vld [vmem:[#allocation3 + $0x60] sm:$0xff] }
 0x27b   : > { %v1031_v51 = vsel %vm1030_vm11, %v1026_v19, inf }
 0x27c   : > { %1032 = vmin.xlane.f32.xlu1 %v1031_v51  ;;  %v828_v28 = vshll.u32 %v827_v32, 16 }
 0x2d9   : > { %v793_v53 = vpop.xlane.xlu0 %792 }
 0x2da   : > { %v794_v14 = vcvt.f32.s32 %v793_v53  ;;  %v843_v53 = vcvt.f32.s32 %v2630_v34  ;;  %v1074_v34 = vld [vmem:[#allocation3 + $0x20] sm:$0xff] }
 0x2dc   : > { %v797_v49 = vadd.s32 %v796_v56, %v794_v14 }
 0x2de   : > { %v1086_v57 = vsel %vm1054_vm5, %v797_v49, %v1070_v12  ;;  %vm2899_vm5 = vcmp.lt.f32.partialorder %v2194_v59, %v2187_v48  ;;  %v1080_v48 = vld [vmem:[#allocation3 + $0x50] sm:$0xff]  ;;  %v1079_v59 = vld [vmem:[#allocation3 + $0x48] sm:$0xff]  ;;  %v860_v12 = vshll.u32 %v859_v61, 16 }
 0x2df   : > { %1103 = vst.msk [vmem:[#allocation3] sm:$0xff] %vm1102_vm2, %v1086_v57  ;;  %v921_v20 = vpop.xlane.xlu0 %920 }
 0x2e0   : > { %v922_v37 = vcvt.f32.s32 %v921_v20  ;;  %v844_v20 = vshll.u32 %v843_v53, 16  ;;  %v2912_v53 = vld [vmem:[#allocation15_spill] sm:$0xff] }
 0x2e1   : > { %vm2913_vm0 = vcmp.lt.f32.partialorder %v2332_v16, %v2912_v53 }
 0x2e2   : > { %v925_v7 = vadd.s32 %v924_v0, %v922_v37  ;;  %v1073_v37 = vld [vmem:[#allocation3 + $0x18] sm:$0xff] }
 0x2e3   : > { %v825_v26 = vpop.xlane.xlu0 %824 }
 0x2e4   : > { %v1094_v15 = vsel %vm1062_vm12, %v925_v7, %v1078_v5  ;;  %v826_v46 = vcvt.f32.s32 %v825_v26  ;;  %vm2900_vm12 = vcmp.lt.f32.partialorder %v2192_v58, %v2178_v45  ;;  %v891_v7 = vcvt.f32.s32 %v2645_v52  ;;  %v1081_v52 = vld [vmem:[#allocation3 + $0x58] sm:$0xff] }
 0x2e5   : > { %1111 = vst.msk [vmem:[#allocation3 + $0x40] sm:$0xff] %vm1102_vm2, %v1094_v15  ;;  %v972_v15 = vshll.u32 %v971_v47, 16 }
 0x2e6   : > { %v829_v27 = vadd.s32 %v828_v28, %v826_v46  ;;  %v809_v25 = vpop.xlane.xlu1 %808  ;;  %v875_v46 = vcvt.f32.s32 %v2650_v30 }
 0x2e7   : > { %v810_v55 = vcvt.f32.s32 %v809_v25  ;;  %v892_v25 = vshll.u32 %v891_v7, 16 }
 0x2e8   : > { %v1088_v10 = vsel %vm2899_vm5, %v829_v27, %v1072_v33  ;;  %v2906_v33 = vld [vmem:[#allocation14_spill] sm:$0xff] }
 0x2e9   : > { %1105 = vst.msk [vmem:[#allocation3 + $0x10] sm:$0xff] %vm1102_vm2, %v1088_v10  ;;  %v813_v62 = vadd.s32 %v812_v60, %v810_v55  ;;  %v953_v40 = vpop.xlane.xlu0 %952  ;;  %vm2907_vm9 = vcmp.lt.f32.partialorder %v2905_v43, %v2906_v33  ;;  %v1019_v60 = vcvt.f32.s32 %v2655_v36  ;;  %v1076_v55 = vld [vmem:[#allocation3 + $0x30] sm:$0xff]  ;;  %v876_v10 = vshll.u32 %v875_v46, 16 }
 0x2ea   : > { %v937_v19 = vpop.xlane.xlu1 %936  ;;  %v954_v4 = vcvt.f32.s32 %v953_v40  ;;  %v1075_v40 = vld [vmem:[#allocation3 + $0x28] sm:$0xff] }
 0x2eb   : > { %v1087_v51 = vsel %vm2900_vm12, %v813_v62, %v1071_v9  ;;  %v938_v1 = vcvt.f32.s32 %v937_v19  ;;  %v2908_v9 = vld [vmem:[#allocation13_spill] sm:$0xff]  ;;  %v1020_v36 = vshll.u32 %v1019_v60, 16 }
 0x2ec   : > { %1104 = vst.msk [vmem:[#allocation3 + $0x8] sm:$0xff] %vm1102_vm2, %v1087_v51  ;;  %v957_v56 = vadd.s32 %v956_v41, %v954_v4  ;;  %vm2909_vm7 = vcmp.lt.f32.partialorder %v2282_v38, %v2908_v9  ;;  %v907_v38 = vcvt.f32.s32 %v2664_v6  ;;  %v1035_v6 = vcvt.f32.s32 %v2669_v39 }
 0x2ed   : > { %v941_v14 = vadd.s32 %v940_v2, %v938_v1  ;;  %v2910_v2 = vld [vmem:[#allocation18_spill] sm:$0xff]  ;;  %v1004_v1 = vshll.u32 %v1003_v42, 16 }
 0x2ee   : > { %v857_v24 = vpop.xlane.xlu0 %856  ;;  %v1096_v49 = vsel %vm2901_vm10, %v957_v56, %v1080_v48  ;;  %vm2911_vm15 = vcmp.lt.f32.partialorder %v2383_v13, %v2910_v2  ;;  %v1084_v48 = vld [vmem:[#allocation3 + $0x70] sm:$0xff]  ;;  %v2914_v13 = vld [vmem:[#allocation19_spill] sm:$0xff]  ;;  %v1036_v47 = vshll.u32 %v1035_v6, 16 }
 0x2ef   : > { %v1095_v45 = vsel %vm2902_vm8, %v941_v14, %v1079_v59  ;;  %v858_v58 = vcvt.f32.s32 %v857_v24  ;;  %1113 = vst.msk [vmem:[#allocation3 + $0x50] sm:$0xff] %vm1102_vm2, %v1096_v49  ;;  %v1083_v24 = vld [vmem:[#allocation3 + $0x68] sm:$0xff]  ;;  %vm2915_vm1 = vcmp.lt.f32.partialorder %v2438_v18, %v2914_v13 }
 0x2f0   : > { %1112 = vst.msk [vmem:[#allocation3 + $0x48] sm:$0xff] %vm1102_vm2, %v1095_v45  ;;  %v841_v57 = vpop.xlane.xlu1 %840  ;;  %v2918_v18 = vld [vmem:[#allocation20_spill] sm:$0xff] }
 0x2f1   : > { %v861_v0 = vadd.s32 %v860_v12, %v858_v58  ;;  %v842_v32 = vcvt.f32.s32 %v841_v57  ;;  %v908_v58 = vshll.u32 %v907_v38, 16  ;;  %vm2919_vm13 = vcmp.lt.f32.partialorder %v2440_v29, %v2918_v18 }
 0x2f2   : > { %v985_v5 = vpop.xlane.xlu0 %984 }
 0x2f3   : > { %v1090_v54 = vsel %vm2903_vm14, %v861_v0, %v1074_v34  ;;  %v845_v63 = vadd.s32 %v844_v20, %v842_v32  ;;  %v986_v17 = vcvt.f32.s32 %v985_v5  ;;  %v2916_v34 = vld [vmem:[#allocation17_spill] sm:$0xff]  ;;  %v1077_v20 = vld [vmem:[#allocation3 + $0x38] sm:$0xff] }
 0x2f4   : > { %1107 = vst.msk [vmem:[#allocation3 + $0x20] sm:$0xff] %vm1102_vm2, %v1090_v54  ;;  %vm2917_vm3 = vcmp.lt.f32.partialorder %v2381_v23, %v2916_v34 }
 0x2f5   : > { %v1089_v26 = vsel %vm2904_vm4, %v845_v63, %v1073_v37  ;;  %v989_v28 = vadd.s32 %v988_v8, %v986_v17  ;;  %v969_v50 = vpop.xlane.xlu1 %968  ;;  %v1085_v8 = vld [vmem:[#allocation3 + $0x78] sm:$0xff] }
 0x2f6   : > { %1106 = vst.msk [vmem:[#allocation3 + $0x18] sm:$0xff] %vm1102_vm2, %v1089_v26  ;;  %v970_v31 = vcvt.f32.s32 %v969_v50 }
 0x2f7   : > { %v1098_v35 = vsel %vm2907_vm9, %v989_v28, %v1082_v3  ;;  %v889_v27 = vpop.xlane.xlu0 %888 }
 0x2f8   : > { %1115 = vst.msk [vmem:[#allocation3 + $0x60] sm:$0xff] %vm1102_vm2, %v1098_v35  ;;  %v973_v11 = vadd.s32 %v972_v15, %v970_v31  ;;  %v890_v22 = vcvt.f32.s32 %v889_v27 }
 0x2f9   : > { %v873_v30 = vpop.xlane.xlu1 %872 }
 0x2fa   : > { %v1097_v62 = vsel %vm2909_vm7, %v973_v11, %v1081_v52  ;;  %v893_v41 = vadd.s32 %v892_v25, %v890_v22  ;;  %v874_v61 = vcvt.f32.s32 %v873_v30 }
 0x2fb   : > { %1114 = vst.msk [vmem:[#allocation3 + $0x58] sm:$0xff] %vm1102_vm2, %v1097_v62  ;;  %v1017_v19 = vpop.xlane.xlu0 %1016 }
 0x2fc   : > { %v1092_v51 = vsel %vm2911_vm15, %v893_v41, %v1076_v55  ;;  %v877_v4 = vadd.s32 %v876_v10, %v874_v61  ;;  %v1018_v44 = vcvt.f32.s32 %v1017_v19 }
 0x2fd   : > { %1109 = vst.msk [vmem:[#allocation3 + $0x30] sm:$0xff] %vm1102_vm2, %v1092_v51  ;;  %v1001_v59 = vpop.xlane.xlu1 %1000 }
 0x2fe   : > { %v1091_v56 = vsel %vm2913_vm0, %v877_v4, %v1075_v40  ;;  %v1021_v14 = vadd.s32 %v1020_v36, %v1018_v44  ;;  %v1002_v12 = vcvt.f32.s32 %v1001_v59 }
 0x2ff   : > { %1108 = vst.msk [vmem:[#allocation3 + $0x28] sm:$0xff] %vm1102_vm2, %v1091_v56 }
 0x300   : > { %v1100_v21 = vsel %vm2915_vm1, %v1021_v14, %v1084_v48  ;;  %v1005_v49 = vadd.s32 %v1004_v1, %v1002_v12 }
 0x301   : > { %1117 = vst.msk [vmem:[#allocation3 + $0x70] sm:$0xff] %vm1102_vm2, %v1100_v21  ;;  %v905_v45 = vpop.xlane.xlu1 %904 }
 0x302   : > { %v1099_v16 = vsel %vm2917_vm3, %v1005_v49, %v1083_v24  ;;  %v906_v57 = vcvt.f32.s32 %v905_v45 }
 0x303   : > { %1116 = vst.msk [vmem:[#allocation3 + $0x68] sm:$0xff] %vm1102_vm2, %v1099_v16 }
 0x304   : > { %v909_v0 = vadd.s32 %v908_v58, %v906_v57 }
 0x305   : > { %v1033_v32 = vpop.xlane.xlu1 %1032 }
 0x306   : > { %v1093_v37 = vsel %vm2919_vm13, %v909_v0, %v1077_v20  ;;  %v1034_v5 = vcvt.f32.s32 %v1033_v32 }
 0x307   : > { %1110 = vst.msk [vmem:[#allocation3 + $0x38] sm:$0xff] %vm1102_vm2, %v1093_v37  ;;  %1170 = sbr.rel (%p1492_p6) target bundleno = 939 (0x3ab), region = 67 }
 0x308   : > { %v1037_v39 = vadd.s32 %v1036_v47, %v1034_v5 }
 0x30a   : > { %v1101_v23 = vsel %vm1069_vm6, %v1037_v39, %v1085_v8 }
 0x30b   : > { %1118 = vst.msk [vmem:[#allocation3 + $0x78] sm:$0xff] %vm1102_vm2, %v1101_v23 }
 0x30c   : > { %v1173_v17 = vld [vmem:[#allocation3 + $0x10] sm:$0xff]  ;;  %v1171_v7 = vld [vmem:[#allocation3] sm:$0xff]  ;;  %v1719_v3 = vmov 0   ;;  %v1174_v29 = vld [vmem:[#allocation3 + $0x18] sm:$0xff]  ;;  %v2922_v11 = vlaneseq  ;;  %vm1246_vm2 = vcmask 130112   ;;  %vm1253_vm6 = vcmask 195712  }
 0x30d   : > { %1605 = vset.pattern.permute.xlu1 %v1719_v3  ;;  %1604 = vset.pattern.permute.xlu0 %v1719_v3  ;;  %v1172_v26 = vld [vmem:[#allocation3 + $0x8] sm:$0xff]  ;;  %v1175_v50 = vld [vmem:[#allocation3 + $0x20] sm:$0xff]  ;;  %v1177_v46 = vld [vmem:[#allocation3 + $0x30] sm:$0xff]  ;;  %vm1260_vm11 = vcmask 261312   ;;  %vm1267_vm5 = vcmask 326912   ;;  %vm1274_vm12 = vcmask 392512  }
 0x30e   : > { %1194 = vperm.xlu1 %1605, %v1173_v17   ;;  %1188 = vperm.xlu0 %1604, %v1171_v7   ;;  %v1176_v28 = vld [vmem:[#allocation3 + $0x28] sm:$0xff]  ;;  %v1178_v15 = vld [vmem:[#allocation3 + $0x38] sm:$0xff]  ;;  %v1179_v43 = vld [vmem:[#allocation3 + $0x40] sm:$0xff]  ;;  %v2755_v22 = vand.u32 127, %v2922_v11  ;;  %vm1281_vm10 = vcmask 458112   ;;  %vm1288_vm8 = vcmask 523712  }
 0x30f   : > { %v1180_v31 = vld [vmem:[#allocation3 + $0x48] sm:$0xff]  ;;  %v1182_v33 = vld [vmem:[#allocation3 + $0x58] sm:$0xff]  ;;  %v1181_v35 = vld [vmem:[#allocation3 + $0x50] sm:$0xff]  ;;  %vm1295_vm14 = vcmask 589312   ;;  %vm1302_vm4 = vcmask 654912   ;;  %vm1309_vm9 = vcmask 720512  }
 0x310   : > { %v1184_v52 = vld [vmem:[#allocation3 + $0x68] sm:$0xff]  ;;  %v1183_v27 = vld [vmem:[#allocation3 + $0x60] sm:$0xff]  ;;  %v1185_v60 = vld [vmem:[#allocation3 + $0x70] sm:$0xff]  ;;  %v1241_v42 = vadd.s32 4294967288, %v2755_v22  ;;  %v1248_v55 = vadd.s32 4294967280, %v2755_v22  ;;  %v1255_v30 = vadd.s32 4294967272, %v2755_v22 }
 0x311   : > { %v2923_v62 = vld [vmem:[#allocation12_spill] sm:$0xff]  ;;  %v1262_v40 = vadd.s32 4294967264, %v2755_v22  ;;  %v1269_v36 = vadd.s32 4294967256, %v2755_v22  ;;  %v1276_v59 = vadd.s32 4294967248, %v2755_v22  ;;  %v1283_v56 = vadd.s32 4294967240, %v2755_v22 }
 0x312   : > { %1197 = vperm.xlu1 %1605, %v1174_v29   ;;  %1191 = vperm.xlu0 %1604, %v1172_v26   ;;  %v1186_v25 = vld [vmem:[#allocation3 + $0x78] sm:$0xff]  ;;  %v1239_v41 = vsub.s32 %v2755_v22, %v2923_v62  ;;  %v1244_v61 = vsub.s32 %v1241_v42, %v2923_v62  ;;  %v1251_v19 = vsub.s32 %v1248_v55, %v2923_v62  ;;  %v1290_v6 = vadd.s32 4294967232, %v2755_v22 }
 0x313   : > { %v1258_v2 = vsub.s32 %v1255_v30, %v2923_v62  ;;  %v1265_v48 = vsub.s32 %v1262_v40, %v2923_v62  ;;  %v1272_v53 = vsub.s32 %v1269_v36, %v2923_v62  ;;  %v1279_v58 = vsub.s32 %v1276_v59, %v2923_v62 }
 0x314   : > { %v1286_v16 = vsub.s32 %v1283_v56, %v2923_v62  ;;  %v1297_v57 = vadd.s32 4294967224, %v2755_v22  ;;  %v1293_v18 = vsub.s32 %v1290_v6, %v2923_v62  ;;  %v1304_v37 = vadd.s32 4294967216, %v2755_v22 }
 0x315   : > { %v1311_v54 = vadd.s32 4294967208, %v2755_v22  ;;  %v1318_v29 = vadd.s32 4294967200, %v2755_v22  ;;  %vm1316_vm7 = vcmask 786112   ;;  %vm1323_vm15 = vcmask 851712  }
 0x316   : > { %1203 = vperm.xlu1 %1605, %v1176_v28   ;;  %1200 = vperm.xlu0 %1604, %v1175_v50   ;;  %v1300_v39 = vsub.s32 %v1297_v57, %v2923_v62  ;;  %v1307_v3 = vsub.s32 %v1304_v37, %v2923_v62  ;;  %vm1330_vm0 = vcmask 917312   ;;  %vm1337_vm1 = vcmask 982912  }
 0x317   : > { %v1314_v50 = vsub.s32 %v1311_v54, %v2923_v62  ;;  %vm1344_vm3 = vcmask 1048512  }
 0x31a   : > { %1209 = vperm.xlu1 %1605, %v1178_v15   ;;  %1206 = vperm.xlu0 %1604, %v1177_v46   ;;  %v1325_v15 = vadd.s32 4294967192, %v2755_v22 }
 0x31c   : > { %v1328_v11 = vsub.s32 %v1325_v15, %v2923_v62 }
 0x31e   : > { %1215 = vperm.xlu1 %1605, %v1180_v31   ;;  %1212 = vperm.xlu0 %1604, %v1179_v43  }
 0x322   : > { %1221 = vperm.xlu1 %1605, %v1182_v33   ;;  %1218 = vperm.xlu0 %1604, %v1181_v35   ;;  %v1321_v35 = vsub.s32 %v1318_v29, %v2923_v62 }
 0x326   : > { %1227 = vperm.xlu1 %1605, %v1184_v52   ;;  %1224 = vperm.xlu0 %1604, %v1183_v27   ;;  %v1339_v52 = vadd.s32 4294967176, %v2755_v22  ;;  %v1332_v27 = vadd.s32 4294967184, %v2755_v22 }
 0x32a   : > { %1233 = vperm.xlu1 %1605, %v1186_v25   ;;  %1230 = vperm.xlu0 %1604, %v1185_v60  }
 0x389   : > { %v1195_v10 = vpop.permute.xlu1 %1194  ;;  %v1189_v9 = vpop.permute.xlu0 %1188 }
 0x38a   : > { %v1240_v44 = vrot.slane %v1189_v9, %v1239_v41  ;;  %v1252_v38 = vrot.slane %v1195_v10, %v1251_v19  ;;  %v1342_v9 = vsub.s32 %v1339_v52, %v2923_v62  ;;  %v1335_v41 = vsub.s32 %v1332_v27, %v2923_v62 }
 0x38d   : > { %v1198_v51 = vpop.permute.xlu1 %1197  ;;  %v1192_v4 = vpop.permute.xlu0 %1191 }
 0x38e   : > { %v1245_v1 = vrot.slane %v1192_v4, %v1244_v61  ;;  %v1259_v14 = vrot.slane %v1198_v51, %v1258_v2 }
 0x390   : > { %v1247_v12 = vsel %vm1246_vm2, %v1245_v1, %v1240_v44 }
 0x391   : > { %v1254_v24 = vsel %vm1253_vm6, %v1252_v38, %v1247_v12  ;;  %v1204_v13 = vpop.permute.xlu1 %1203  ;;  %v1201_v21 = vpop.permute.xlu0 %1200 }
 0x392   : > { %v1261_v49 = vsel %vm1260_vm11, %v1259_v14, %v1254_v24  ;;  %v1266_v45 = vrot.slane %v1201_v21, %v1265_v48  ;;  %v1273_v34 = vrot.slane %v1204_v13, %v1272_v53 }
 0x394   : > { %v1268_v20 = vsel %vm1267_vm5, %v1266_v45, %v1261_v49 }
 0x395   : > { %v1210_v0 = vpop.permute.xlu1 %1209  ;;  %v1207_v32 = vpop.permute.xlu0 %1206  ;;  %v1275_v8 = vsel %vm1274_vm12, %v1273_v34, %v1268_v20 }
 0x396   : > { %v1280_v47 = vrot.slane %v1207_v32, %v1279_v58  ;;  %v1287_v5 = vrot.slane %v1210_v0, %v1286_v16 }
 0x398   : > { %v1282_v63 = vsel %vm1281_vm10, %v1280_v47, %v1275_v8 }
 0x399   : > { %v1216_v23 = vpop.permute.xlu1 %1215  ;;  %v1213_v17 = vpop.permute.xlu0 %1212  ;;  %v1289_v28 = vsel %vm1288_vm8, %v1287_v5, %v1282_v63 }
 0x39a   : > { %v1294_v7 = vrot.slane %v1213_v17, %v1293_v18  ;;  %v1301_v26 = vrot.slane %v1216_v23, %v1300_v39 }
 0x39c   : > { %v1296_v46 = vsel %vm1295_vm14, %v1294_v7, %v1289_v28 }
 0x39d   : > { %v1222_v31 = vpop.permute.xlu1 %1221  ;;  %v1219_v43 = vpop.permute.xlu0 %1218  ;;  %v1303_v60 = vsel %vm1302_vm4, %v1301_v26, %v1296_v46 }
 0x39e   : > { %v1308_v33 = vrot.slane %v1219_v43, %v1307_v3  ;;  %v1315_v25 = vrot.slane %v1222_v31, %v1314_v50 }
 0x3a0   : > { %v1310_v42 = vsel %vm1309_vm9, %v1308_v33, %v1303_v60 }
 0x3a1   : > { %v1228_v55 = vpop.permute.xlu1 %1227  ;;  %v1225_v30 = vpop.permute.xlu0 %1224  ;;  %v1317_v40 = vsel %vm1316_vm7, %v1315_v25, %v1310_v42 }
 0x3a2   : > { %v1322_v10 = vrot.slane %v1225_v30, %v1321_v35  ;;  %v1329_v61 = vrot.slane %v1228_v55, %v1328_v11 }
 0x3a4   : > { %v1324_v19 = vsel %vm1323_vm15, %v1322_v10, %v1317_v40 }
 0x3a5   : > { %v1234_v22 = vpop.permute.xlu1 %1233  ;;  %v1231_v36 = vpop.permute.xlu0 %1230  ;;  %v1331_v4 = vsel %vm1330_vm0, %v1329_v61, %v1324_v19 }
 0x3a6   : > { %v1343_v2 = vrot.slane %v1234_v22, %v1342_v9  ;;  %v1336_v51 = vrot.slane %v1231_v36, %v1335_v41 }
 0x3a8   : > { %v1338_v44 = vsel %vm1337_vm1, %v1336_v51, %v1331_v4 }
 0x3a9   : > { %v1345_v1 = vsel %vm1344_vm3, %v1343_v2, %v1338_v44 }
 0x3aa   : > { %1346 = vst [vmem:[%s1891_s22] sm:$0x1] %v1345_v1 }
 0x3ab PF: > { %s1358_s8 = scalar_lea.hbm %s2847_s4, %s1867_s12  ;;  %s1360_s13 = sshll.u32 %s1891_s22, 4  ;;  %s1361_s13 = int_to_ptr.vmem [resolvable:$true] %s1360_s13 }
 0x3ac   : > { %s2924_s14 = sand.u32 1, %s1682_s16   ;;  %s1606_s29 = scalar_lea.vmem %s1361_s13, 16 }
 0x3ad   : > { %s1348_s25 = scalar_lea.sflag [#allocation6], %s2924_s14  ;;  %p1607_p7 = scmp.ne.s32.totalorder %s1361_s13, %s1606_s29 }
 0x3ae   : > { %s1720_s26 = smov [#allocation5]  }
 0x3af   : > { %p1608_p8 = pnand %p1607_p7, %p1825_p10  ;;  %s1610_s30 = sshll.u32 %s1720_s26, 4  ;;  %s1611_s30 = int_to_ptr.vmem [resolvable:$false] %s1610_s30 }
 0x3b0   : > { %s1612_s18 = scalar_lea.vmem %s1611_s30, 32  ;;  %p1613_p11 = scmp.lt.s32.totalorder %s1361_s13, %s1611_s30 }
 0x3b1   : > { %p1609_p9 = pneg %p1608_p8  ;;  %p1614_p13 = scmp.lt.s32.totalorder %s1612_s18, %s1606_s29 }
 0x3b3   : > { %p1615_p0 = por %p1614_p13, %p1613_p11 }
 0x3b5   : > { %p1616_p1 = pnand %p1615_p0, %p1609_p9 }
 0x3b7   : > { %1619 = shalt.err (!%p1616_p1)
}
 0x3b8   : > { %s1620_s5 = scalar_lea.hbm %s1358_s8, 16  ;;  %s1624_s21 = scalar_lea.hbm %s2847_s4, 32 }
 0x3b9   : > { %p1621_p2 = scmp.ne.s32.totalorder %s1358_s8, %s1620_s5  ;;  %p1625_p5 = scmp.lt.s32.totalorder %s1358_s8, %s2847_s4 }
 0x3ba   : > { %p1626_p6 = scmp.lt.s32.totalorder %s1624_s21, %s1620_s5 }
 0x3bb   : > { %p1622_p3 = pnand %p1621_p2, %p1825_p10 }
 0x3bc   : > { %p1627_p7 = por %p1626_p6, %p1625_p5 }
 0x3bd   : > { %p1623_p4 = pneg %p1622_p3 }
 0x3bf   : > { %p1628_p8 = pnand %p1627_p7, %p1623_p4 }
 0x3c1   : > { %1631 = shalt.err (!%p1628_p8)
}
 0x3c2   : > { %1513 = dma.vmem_to_hbm [thread:$0]  (%p1825_p10), %s1361_s13, 16, %s1358_s8, %s1348_s25  }
 0x3c3 PF: > { %p1519_p9 = scmp.ge.s32.totalorder %s1714_s24, 2  ;;  %s1372_s27 = sand.u32 1, %s1678_s15  }
 0x3c4   : > { %s1373_s6 = scalar_lea.sflag [#allocation6], %s1372_s27 }
 0x3c5   : > { %p1516_p11 = pnand %p1519_p9, %p1832_p12 }
 0x3c7   : > { %p1517_p13 = pneg %p1516_p11 }
 0x3c9   : > { %1673 = dma.done.wait (%p1517_p13), %s1373_s6, 16  }
 0x3ca   : > { %1675 = vsyncadd (%p1517_p13), %s1373_s6, 4294967280  ;;  %s17_s24 = sadd.s32 1, %s1714_s24   ;;  %s2925_s20 = sld [smem:[#allocation8_spill]] }
 0x3cb   : > { %p14_p0 = scmp.ge.s32.totalorder %s17_s24, 6   ;;  %s2926_s21 = sld [smem:[#allocation9_spill]] }
 0x3cc   : > { %s2927_s22 = sld [smem:[#allocation10_spill]]  ;;  %s2929_s15 = smov %s1682_s16 }
 0x3cd   : > { %s2928_s23 = sld [smem:[#allocation11_spill]]  ;;  %s2930_s16 = smov %s1686_s17 }
 0x3ce   : > { %s2931_s17 = smov %s1830_s10  ;;  %s2932_s18 = smov %s1694_s19 }
 0x3cf   : > { %s2933_s19 = smov %s1819_s7  ;;  %16 = sbr.rel (!%p14_p0) target bundleno = 8 (0x8), region = 116 }
 0x3d4   :  { %1377 = vsyncpa [#allocation6], 1 }
 0x3d5   :  { %1379 = vsyncpa [#allocation6 + $0x1], 1 }

</bundles_post_ra>
